<compile_context>
chip_gen: v7x
topology: tpu7x:2x2x1
jax: 0.10.0
libtpu: 0.0.40
codegen_flags: <defaults>
</compile_context>

<pallas_src>
import jax
import jax.numpy as jnp
import numpy as np
from jax.experimental import pallas as pl
from jax.experimental.pallas import tpu as pltpu  # noqa: F401  (gridless whole-array VMEM blocks)

# ---- static problem sizes (flatten size must be 2400, as the module requires) ----
B = 2
CIN, H, W = 1, 6, 10
KH, KW = 3, 5
COUT = 400
H_OUT, W_OUT = H - KH + 1, W - KW + 1      # 4, 6
PH, PW = H_OUT // 2, W_OUT // 2            # 2, 3
S = PH * PW                                # 6 pooled spatial positions
G = 4                                      # 2x2 pool-window offsets (dh, dw)
K = CIN * KH * KW                          # 15 conv-window elements
FLAT = COUT * S                            # 2400
F1, F2 = 20, 23
LANES = 128                                # lane-padded fc2 width / output width
BP = 8                                     # batch rows padded to one full sublane group
ROWS_PER_S = G * BP                        # 32 rows per pooled position
NEG_BIG = -1e30
assert FLAT == 2400


def cnn_kernel(patches_ref, wc_ref, w1_ref, w2_ref, b2_ref, out_ref):
    # patches_ref: (S*G*BP, K+1) bf16  rows ordered (s, g, b_pad); last column is the
    #              "ones" bias column (0 on padded rows).
    # wc_ref:      (K+1, COUT)   bf16  last row = conv bias.
    # w1_ref:      (S*COUT, F1)  bf16  row s*COUT + c  == fc1 weight W1[j, c*S + s].
    # w2_ref:      (F1, LANES)   bf16  lanes >= F2 are zero.
    # b2_ref:      (1, LANES)    f32   real lanes = b2 + b1 @ W2^T (fc1 bias folded through
    #              fc2); padded lanes = -1e30 so log_softmax ignores them.
    # out_ref:     (BP, LANES)   f32   only rows [:B] and lanes [:F2] are meaningful.
    wc = wc_ref[...]
    h = jnp.zeros((BP, F1), jnp.float32)
    for s in range(S):                                   # static, unrolled (6 iterations)
        # conv for pooled position s: (32, 16) x (16, 400) -> (32, 400), f32 accumulate.
        conv_s = jnp.dot(patches_ref[s * ROWS_PER_S:(s + 1) * ROWS_PER_S, :], wc,
                         preferred_element_type=jnp.float32)
        # 2x2 max-pool == max over the 4 window offsets; each slab is 8 aligned sublanes.
        pooled = jnp.maximum(
            jnp.maximum(conv_s[0 * BP:1 * BP, :], conv_s[1 * BP:2 * BP, :]),
            jnp.maximum(conv_s[2 * BP:3 * BP, :], conv_s[3 * BP:4 * BP, :]))
        pooled = jnp.maximum(pooled, 0.0)                                 # ReLU, (8, 400)
        # fc1 contribution of pooled position s: (8, 400) x (400, 20), f32 accumulate.
        h = h + jnp.dot(pooled.astype(jnp.bfloat16),
                        w1_ref[s * COUT:(s + 1) * COUT, :],
                        preferred_element_type=jnp.float32)
    # fc2 into a lane-padded 128-wide output (f32 bias carries the folded fc1 bias).
    logits = jnp.dot(h.astype(jnp.bfloat16), w2_ref[...],
                     preferred_element_type=jnp.float32) + b2_ref[...]    # (8, 128) f32
    # log_softmax along lanes; padded lanes contribute exp(~-1e30) == 0.
    m = jnp.max(logits, axis=-1, keepdims=True)
    shifted = logits - m
    out_ref[...] = shifted - jnp.log(jnp.sum(jnp.exp(shifted), axis=-1, keepdims=True))


def _build_patch_indices():
    # Flat gather indices into x_flat (B, H*W + 1); index H*W picks the "ones" bias column.
    idx = np.zeros((S, G, K + 1), np.int32)
    for s in range(S):
        ph, pw = s // PW, s % PW
        for g in range(G):
            dh, dw = g // 2, g % 2
            for k in range(K):
                kh, kw = k // KW, k % KW
                idx[s, g, k] = (2 * ph + dh + kh) * W + (2 * pw + dw + kw)
            idx[s, g, K] = H * W
    return idx


_FLAT_IDX = _build_patch_indices()


def prepare_params(params):
    """One-time parameter re-layout (NOT in the per-call path)."""
    convw, convb, w1, b1, w2, b2 = params
    # conv weight -> (K, COUT) with the bias appended as the last row (ones-column fold).
    wc = convw.reshape(COUT, K).T                                          # (15, 400)
    wc_aug = jnp.concatenate([wc, convb.reshape(1, COUT)], axis=0)         # (16, 400)
    # fc1 weight: PyTorch flatten column = c*S + s  ->  row layout s*COUT + c.
    w1r = w1.reshape(F1, COUT, S).transpose(2, 1, 0).reshape(S * COUT, F1)  # (2400, 20)
    # fc2 padded to 128 lanes; fold fc1 bias through fc2; padded lanes get -1e30 (f32).
    w2p = jnp.zeros((F1, LANES), jnp.float32).at[:, :F2].set(w2.T)
    b2_eff = jnp.full((1, LANES), NEG_BIG, jnp.float32).at[:, :F2].set(b2 + b1 @ w2.T)
    return (wc_aug.astype(jnp.bfloat16), w1r.astype(jnp.bfloat16),
            w2p.astype(jnp.bfloat16), b2_eff)


@jax.jit
def cnn_forward(x, prepared):
    wc_aug, w1r, w2p, b2_eff = prepared

    # --- glue: im2col as ONE flat gather; rows (s, g, b_pad8); last column = bias "ones" ---
    x_flat = x.reshape(B, H * W)
    x_flat = jnp.concatenate([x_flat, jnp.ones((B, 1), x_flat.dtype)], axis=1)  # (B, 61)
    x_flat = jnp.pad(x_flat, ((0, BP - B), (0, 0)))        # padded rows are all-zero
    patches = x_flat[:, _FLAT_IDX]                          # (BP, S, G, K+1)
    patches = jnp.transpose(patches, (1, 2, 0, 3)).reshape(S * G * BP, K + 1)
    patches = patches.astype(jnp.bfloat16)                  # (192, 16), ~6 KB

    # Gridless: whole arrays live in VMEM (~0.12 MB total), single invocation.
    flops = 2 * (S * G * BP) * (K + 1) * COUT + S * 2 * BP * COUT * F1 + 2 * BP * F1 * LANES
    bytes_accessed = (patches.size * 2 + wc_aug.size * 2 + w1r.size * 2
                      + w2p.size * 2 + b2_eff.size * 4 + BP * LANES * 4)
    out = pl.pallas_call(
        cnn_kernel,
        out_shape=jax.ShapeDtypeStruct((BP, LANES), jnp.float32),
        cost_estimate=pl.CostEstimate(flops=flops,
                                      transcendentals=BP * LANES + BP,
                                      bytes_accessed=bytes_accessed),
    )(patches, wc_aug, w1r, w2p, b2_eff)
    # Rows >= B and lanes >= F2 are padding garbage; only this slice is valid.
    return out[:B, :F2]


def reference_forward(x, params):
    convw, convb, w1, b1, w2, b2 = params
    out = jax.lax.conv_general_dilated(
        x, convw, window_strides=(1, 1), padding="VALID",
        dimension_numbers=("NCHW", "OIHW", "NCHW"))
    out = out + convb.reshape(1, COUT, 1, 1)
    out = jax.lax.reduce_window(out, -jnp.inf, jax.lax.max,
                                (1, 1, 2, 2), (1, 1, 2, 2), "VALID")
    out = jnp.maximum(out, 0.0)
    flat = out.reshape(B, FLAT)
    h = flat @ w1.T + b1
    logits = h @ w2.T + b2
    return jax.nn.log_softmax(logits, axis=1)


if __name__ == "__main__":
    key = jax.random.PRNGKey(0)
    keys = jax.random.split(key, 7)
    convw = jax.random.normal(keys[0], (COUT, CIN, KH, KW), jnp.float32) * 0.05
    convb = jax.random.normal(keys[1], (COUT,), jnp.float32) * 0.05
    w1 = jax.random.normal(keys[2], (F1, FLAT), jnp.float32) * 0.02
    b1 = jax.random.normal(keys[3], (F1,), jnp.float32) * 0.02
    w2 = jax.random.normal(keys[4], (F2, F1), jnp.float32) * 0.05
    b2 = jax.random.normal(keys[5], (F2,), jnp.float32) * 0.05
    x = jax.random.normal(keys[6], (B, CIN, H, W), jnp.float32)
    params = (convw, convb, w1, b1, w2, b2)

    prepared = jax.tree_util.tree_map(jax.block_until_ready, prepare_params(params))

    out = jax.block_until_ready(cnn_forward(x, prepared))

    ref = jax.block_until_ready(reference_forward(x, params))
    np.testing.assert_allclose(np.asarray(out), np.asarray(ref), rtol=2e-2, atol=2e-2)
    print("KERNEL_OK")
</pallas_src>

<mosaic_0001>
module attributes {stable_mosaic.version = 11 : i64} {
  func.func @cnn_kernel(%arg0: memref<192x16xbf16, #tpu.memory_space<vmem>>, %arg1: memref<16x400xbf16, #tpu.memory_space<vmem>>, %arg2: memref<2400x20xbf16, #tpu.memory_space<vmem>>, %arg3: memref<20x128xbf16, #tpu.memory_space<vmem>>, %arg4: memref<1x128xf32, #tpu.memory_space<vmem>>, %arg5: memref<8x128xf32, #tpu.memory_space<vmem>>) attributes {dimension_semantics = [], scalar_prefetch = 0 : i64, scratch_operands = 0 : i64, tpu.core_type = #tpu.core_type<tc>} {
    %c0 = arith.constant 0 : index
    %c0_0 = arith.constant 0 : index
    %0 = vector.load %arg1[%c0, %c0_0] : memref<16x400xbf16, #tpu.memory_space<vmem>>, vector<16x400xbf16>
    %cst = arith.constant 0.000000e+00 : f32
    %1 = vector.broadcast %cst : f32 to vector<8x20xf32>
    %c0_1 = arith.constant 0 : index
    %c0_2 = arith.constant 0 : index
    %2 = vector.load %arg0[%c0_1, %c0_2] : memref<192x16xbf16, #tpu.memory_space<vmem>>, vector<32x16xbf16>
    %cst_3 = arith.constant dense<0.000000e+00> : vector<32x400xf32>
    %3 = tpu.matmul %2, %0, %cst_3 {dimension_numbers = #tpu.dot_dimension_numbers<[1], [0], [0], [1], [0, 0, 1, 1], [], []>} : vector<32x16xbf16>, vector<16x400xbf16>, vector<32x400xf32> -> vector<32x400xf32>
    %4 = vector.extract_strided_slice %3 {offsets = [0, 0], sizes = [8, 400], strides = [1, 1]} : vector<32x400xf32> to vector<8x400xf32>
    %5 = vector.extract_strided_slice %3 {offsets = [8, 0], sizes = [8, 400], strides = [1, 1]} : vector<32x400xf32> to vector<8x400xf32>
    %6 = arith.maximumf %4, %5 : vector<8x400xf32>
    %7 = vector.extract_strided_slice %3 {offsets = [16, 0], sizes = [8, 400], strides = [1, 1]} : vector<32x400xf32> to vector<8x400xf32>
    %8 = vector.extract_strided_slice %3 {offsets = [24, 0], sizes = [8, 400], strides = [1, 1]} : vector<32x400xf32> to vector<8x400xf32>
    %9 = arith.maximumf %7, %8 : vector<8x400xf32>
    %10 = arith.maximumf %6, %9 : vector<8x400xf32>
    %cst_4 = arith.constant 0.000000e+00 : f32
    %11 = vector.broadcast %cst_4 : f32 to vector<8x400xf32>
    %12 = arith.maximumf %10, %11 : vector<8x400xf32>
    %13 = arith.truncf %12 : vector<8x400xf32> to vector<8x400xbf16>
    %c0_5 = arith.constant 0 : index
    %c0_6 = arith.constant 0 : index
    %14 = vector.load %arg2[%c0_5, %c0_6] : memref<2400x20xbf16, #tpu.memory_space<vmem>>, vector<400x20xbf16>
    %cst_7 = arith.constant dense<0.000000e+00> : vector<8x20xf32>
    %15 = tpu.matmul %13, %14, %cst_7 {dimension_numbers = #tpu.dot_dimension_numbers<[1], [0], [0], [1], [0, 0, 1, 1], [], []>} : vector<8x400xbf16>, vector<400x20xbf16>, vector<8x20xf32> -> vector<8x20xf32>
    %16 = arith.addf %1, %15 : vector<8x20xf32>
    %c32 = arith.constant 32 : index
    %c0_8 = arith.constant 0 : index
    %17 = vector.load %arg0[%c32, %c0_8] : memref<192x16xbf16, #tpu.memory_space<vmem>>, vector<32x16xbf16>
    %cst_9 = arith.constant dense<0.000000e+00> : vector<32x400xf32>
    %18 = tpu.matmul %17, %0, %cst_9 {dimension_numbers = #tpu.dot_dimension_numbers<[1], [0], [0], [1], [0, 0, 1, 1], [], []>} : vector<32x16xbf16>, vector<16x400xbf16>, vector<32x400xf32> -> vector<32x400xf32>
    %19 = vector.extract_strided_slice %18 {offsets = [0, 0], sizes = [8, 400], strides = [1, 1]} : vector<32x400xf32> to vector<8x400xf32>
    %20 = vector.extract_strided_slice %18 {offsets = [8, 0], sizes = [8, 400], strides = [1, 1]} : vector<32x400xf32> to vector<8x400xf32>
    %21 = arith.maximumf %19, %20 : vector<8x400xf32>
    %22 = vector.extract_strided_slice %18 {offsets = [16, 0], sizes = [8, 400], strides = [1, 1]} : vector<32x400xf32> to vector<8x400xf32>
    %23 = vector.extract_strided_slice %18 {offsets = [24, 0], sizes = [8, 400], strides = [1, 1]} : vector<32x400xf32> to vector<8x400xf32>
    %24 = arith.maximumf %22, %23 : vector<8x400xf32>
    %25 = arith.maximumf %21, %24 : vector<8x400xf32>
    %cst_10 = arith.constant 0.000000e+00 : f32
    %26 = vector.broadcast %cst_10 : f32 to vector<8x400xf32>
    %27 = arith.maximumf %25, %26 : vector<8x400xf32>
    %28 = arith.truncf %27 : vector<8x400xf32> to vector<8x400xbf16>
    %c400 = arith.constant 400 : index
    %c0_11 = arith.constant 0 : index
    %29 = vector.load %arg2[%c400, %c0_11] : memref<2400x20xbf16, #tpu.memory_space<vmem>>, vector<400x20xbf16>
    %cst_12 = arith.constant dense<0.000000e+00> : vector<8x20xf32>
    %30 = tpu.matmul %28, %29, %cst_12 {dimension_numbers = #tpu.dot_dimension_numbers<[1], [0], [0], [1], [0, 0, 1, 1], [], []>} : vector<8x400xbf16>, vector<400x20xbf16>, vector<8x20xf32> -> vector<8x20xf32>
    %31 = arith.addf %16, %30 : vector<8x20xf32>
    %c64 = arith.constant 64 : index
    %c0_13 = arith.constant 0 : index
    %32 = vector.load %arg0[%c64, %c0_13] : memref<192x16xbf16, #tpu.memory_space<vmem>>, vector<32x16xbf16>
    %cst_14 = arith.constant dense<0.000000e+00> : vector<32x400xf32>
    %33 = tpu.matmul %32, %0, %cst_14 {dimension_numbers = #tpu.dot_dimension_numbers<[1], [0], [0], [1], [0, 0, 1, 1], [], []>} : vector<32x16xbf16>, vector<16x400xbf16>, vector<32x400xf32> -> vector<32x400xf32>
    %34 = vector.extract_strided_slice %33 {offsets = [0, 0], sizes = [8, 400], strides = [1, 1]} : vector<32x400xf32> to vector<8x400xf32>
    %35 = vector.extract_strided_slice %33 {offsets = [8, 0], sizes = [8, 400], strides = [1, 1]} : vector<32x400xf32> to vector<8x400xf32>
    %36 = arith.maximumf %34, %35 : vector<8x400xf32>
    %37 = vector.extract_strided_slice %33 {offsets = [16, 0], sizes = [8, 400], strides = [1, 1]} : vector<32x400xf32> to vector<8x400xf32>
    %38 = vector.extract_strided_slice %33 {offsets = [24, 0], sizes = [8, 400], strides = [1, 1]} : vector<32x400xf32> to vector<8x400xf32>
    %39 = arith.maximumf %37, %38 : vector<8x400xf32>
    %40 = arith.maximumf %36, %39 : vector<8x400xf32>
    %cst_15 = arith.constant 0.000000e+00 : f32
    %41 = vector.broadcast %cst_15 : f32 to vector<8x400xf32>
    %42 = arith.maximumf %40, %41 : vector<8x400xf32>
    %43 = arith.truncf %42 : vector<8x400xf32> to vector<8x400xbf16>
    %c800 = arith.constant 800 : index
    %c0_16 = arith.constant 0 : index
    %44 = vector.load %arg2[%c800, %c0_16] : memref<2400x20xbf16, #tpu.memory_space<vmem>>, vector<400x20xbf16>
    %cst_17 = arith.constant dense<0.000000e+00> : vector<8x20xf32>
    %45 = tpu.matmul %43, %44, %cst_17 {dimension_numbers = #tpu.dot_dimension_numbers<[1], [0], [0], [1], [0, 0, 1, 1], [], []>} : vector<8x400xbf16>, vector<400x20xbf16>, vector<8x20xf32> -> vector<8x20xf32>
    %46 = arith.addf %31, %45 : vector<8x20xf32>
    %c96 = arith.constant 96 : index
    %c0_18 = arith.constant 0 : index
    %47 = vector.load %arg0[%c96, %c0_18] : memref<192x16xbf16, #tpu.memory_space<vmem>>, vector<32x16xbf16>
    %cst_19 = arith.constant dense<0.000000e+00> : vector<32x400xf32>
    %48 = tpu.matmul %47, %0, %cst_19 {dimension_numbers = #tpu.dot_dimension_numbers<[1], [0], [0], [1], [0, 0, 1, 1], [], []>} : vector<32x16xbf16>, vector<16x400xbf16>, vector<32x400xf32> -> vector<32x400xf32>
    %49 = vector.extract_strided_slice %48 {offsets = [0, 0], sizes = [8, 400], strides = [1, 1]} : vector<32x400xf32> to vector<8x400xf32>
    %50 = vector.extract_strided_slice %48 {offsets = [8, 0], sizes = [8, 400], strides = [1, 1]} : vector<32x400xf32> to vector<8x400xf32>
    %51 = arith.maximumf %49, %50 : vector<8x400xf32>
    %52 = vector.extract_strided_slice %48 {offsets = [16, 0], sizes = [8, 400], strides = [1, 1]} : vector<32x400xf32> to vector<8x400xf32>
    %53 = vector.extract_strided_slice %48 {offsets = [24, 0], sizes = [8, 400], strides = [1, 1]} : vector<32x400xf32> to vector<8x400xf32>
    %54 = arith.maximumf %52, %53 : vector<8x400xf32>
    %55 = arith.maximumf %51, %54 : vector<8x400xf32>
    %cst_20 = arith.constant 0.000000e+00 : f32
    %56 = vector.broadcast %cst_20 : f32 to vector<8x400xf32>
    %57 = arith.maximumf %55, %56 : vector<8x400xf32>
    %58 = arith.truncf %57 : vector<8x400xf32> to vector<8x400xbf16>
    %c1200 = arith.constant 1200 : index
    %c0_21 = arith.constant 0 : index
    %59 = vector.load %arg2[%c1200, %c0_21] : memref<2400x20xbf16, #tpu.memory_space<vmem>>, vector<400x20xbf16>
    %cst_22 = arith.constant dense<0.000000e+00> : vector<8x20xf32>
    %60 = tpu.matmul %58, %59, %cst_22 {dimension_numbers = #tpu.dot_dimension_numbers<[1], [0], [0], [1], [0, 0, 1, 1], [], []>} : vector<8x400xbf16>, vector<400x20xbf16>, vector<8x20xf32> -> vector<8x20xf32>
    %61 = arith.addf %46, %60 : vector<8x20xf32>
    %c128 = arith.constant 128 : index
    %c0_23 = arith.constant 0 : index
    %62 = vector.load %arg0[%c128, %c0_23] : memref<192x16xbf16, #tpu.memory_space<vmem>>, vector<32x16xbf16>
    %cst_24 = arith.constant dense<0.000000e+00> : vector<32x400xf32>
    %63 = tpu.matmul %62, %0, %cst_24 {dimension_numbers = #tpu.dot_dimension_numbers<[1], [0], [0], [1], [0, 0, 1, 1], [], []>} : vector<32x16xbf16>, vector<16x400xbf16>, vector<32x400xf32> -> vector<32x400xf32>
    %64 = vector.extract_strided_slice %63 {offsets = [0, 0], sizes = [8, 400], strides = [1, 1]} : vector<32x400xf32> to vector<8x400xf32>
    %65 = vector.extract_strided_slice %63 {offsets = [8, 0], sizes = [8, 400], strides = [1, 1]} : vector<32x400xf32> to vector<8x400xf32>
    %66 = arith.maximumf %64, %65 : vector<8x400xf32>
    %67 = vector.extract_strided_slice %63 {offsets = [16, 0], sizes = [8, 400], strides = [1, 1]} : vector<32x400xf32> to vector<8x400xf32>
    %68 = vector.extract_strided_slice %63 {offsets = [24, 0], sizes = [8, 400], strides = [1, 1]} : vector<32x400xf32> to vector<8x400xf32>
    %69 = arith.maximumf %67, %68 : vector<8x400xf32>
    %70 = arith.maximumf %66, %69 : vector<8x400xf32>
    %cst_25 = arith.constant 0.000000e+00 : f32
    %71 = vector.broadcast %cst_25 : f32 to vector<8x400xf32>
    %72 = arith.maximumf %70, %71 : vector<8x400xf32>
    %73 = arith.truncf %72 : vector<8x400xf32> to vector<8x400xbf16>
    %c1600 = arith.constant 1600 : index
    %c0_26 = arith.constant 0 : index
    %74 = vector.load %arg2[%c1600, %c0_26] : memref<2400x20xbf16, #tpu.memory_space<vmem>>, vector<400x20xbf16>
    %cst_27 = arith.constant dense<0.000000e+00> : vector<8x20xf32>
    %75 = tpu.matmul %73, %74, %cst_27 {dimension_numbers = #tpu.dot_dimension_numbers<[1], [0], [0], [1], [0, 0, 1, 1], [], []>} : vector<8x400xbf16>, vector<400x20xbf16>, vector<8x20xf32> -> vector<8x20xf32>
    %76 = arith.addf %61, %75 : vector<8x20xf32>
    %c160 = arith.constant 160 : index
    %c0_28 = arith.constant 0 : index
    %77 = vector.load %arg0[%c160, %c0_28] : memref<192x16xbf16, #tpu.memory_space<vmem>>, vector<32x16xbf16>
    %cst_29 = arith.constant dense<0.000000e+00> : vector<32x400xf32>
    %78 = tpu.matmul %77, %0, %cst_29 {dimension_numbers = #tpu.dot_dimension_numbers<[1], [0], [0], [1], [0, 0, 1, 1], [], []>} : vector<32x16xbf16>, vector<16x400xbf16>, vector<32x400xf32> -> vector<32x400xf32>
    %79 = vector.extract_strided_slice %78 {offsets = [0, 0], sizes = [8, 400], strides = [1, 1]} : vector<32x400xf32> to vector<8x400xf32>
    %80 = vector.extract_strided_slice %78 {offsets = [8, 0], sizes = [8, 400], strides = [1, 1]} : vector<32x400xf32> to vector<8x400xf32>
    %81 = arith.maximumf %79, %80 : vector<8x400xf32>
    %82 = vector.extract_strided_slice %78 {offsets = [16, 0], sizes = [8, 400], strides = [1, 1]} : vector<32x400xf32> to vector<8x400xf32>
    %83 = vector.extract_strided_slice %78 {offsets = [24, 0], sizes = [8, 400], strides = [1, 1]} : vector<32x400xf32> to vector<8x400xf32>
    %84 = arith.maximumf %82, %83 : vector<8x400xf32>
    %85 = arith.maximumf %81, %84 : vector<8x400xf32>
    %cst_30 = arith.constant 0.000000e+00 : f32
    %86 = vector.broadcast %cst_30 : f32 to vector<8x400xf32>
    %87 = arith.maximumf %85, %86 : vector<8x400xf32>
    %88 = arith.truncf %87 : vector<8x400xf32> to vector<8x400xbf16>
    %c2000 = arith.constant 2000 : index
    %c0_31 = arith.constant 0 : index
    %89 = vector.load %arg2[%c2000, %c0_31] : memref<2400x20xbf16, #tpu.memory_space<vmem>>, vector<400x20xbf16>
    %cst_32 = arith.constant dense<0.000000e+00> : vector<8x20xf32>
    %90 = tpu.matmul %88, %89, %cst_32 {dimension_numbers = #tpu.dot_dimension_numbers<[1], [0], [0], [1], [0, 0, 1, 1], [], []>} : vector<8x400xbf16>, vector<400x20xbf16>, vector<8x20xf32> -> vector<8x20xf32>
    %91 = arith.addf %76, %90 : vector<8x20xf32>
    %92 = arith.truncf %91 : vector<8x20xf32> to vector<8x20xbf16>
    %c0_33 = arith.constant 0 : index
    %c0_34 = arith.constant 0 : index
    %93 = vector.load %arg3[%c0_33, %c0_34] : memref<20x128xbf16, #tpu.memory_space<vmem>>, vector<20x128xbf16>
    %cst_35 = arith.constant dense<0.000000e+00> : vector<8x128xf32>
    %94 = tpu.matmul %92, %93, %cst_35 {dimension_numbers = #tpu.dot_dimension_numbers<[1], [0], [0], [1], [0, 0, 1, 1], [], []>} : vector<8x20xbf16>, vector<20x128xbf16>, vector<8x128xf32> -> vector<8x128xf32>
    %c0_36 = arith.constant 0 : index
    %c0_37 = arith.constant 0 : index
    %95 = vector.load %arg4[%c0_36, %c0_37] : memref<1x128xf32, #tpu.memory_space<vmem>>, vector<1x128xf32>
    %96 = vector.broadcast %95 : vector<1x128xf32> to vector<8x128xf32>
    %97 = arith.addf %94, %96 : vector<8x128xf32>
    %cst_38 = arith.constant dense<0xFF800000> : vector<8xf32>
    %98 = vector.multi_reduction <maximumf>, %97, %cst_38 [1] : vector<8x128xf32> to vector<8xf32>
    %99 = vector.shape_cast %98 : vector<8xf32> to vector<8x1xf32>
    %100 = vector.broadcast %99 : vector<8x1xf32> to vector<8x128xf32>
    %101 = arith.subf %97, %100 : vector<8x128xf32>
    %102 = math.exp %101 : vector<8x128xf32>
    %cst_39 = arith.constant dense<0.000000e+00> : vector<8xf32>
    %103 = vector.multi_reduction <add>, %102, %cst_39 [1] : vector<8x128xf32> to vector<8xf32>
    %104 = vector.shape_cast %103 : vector<8xf32> to vector<8x1xf32>
    %105 = math.log %104 : vector<8x1xf32>
    %106 = vector.broadcast %105 : vector<8x1xf32> to vector<8x128xf32>
    %107 = arith.subf %101, %106 : vector<8x128xf32>
    %c0_40 = arith.constant 0 : index
    %c0_41 = arith.constant 0 : index
    %108 = vector.load %arg5[%c0_40, %c0_41] : memref<8x128xf32, #tpu.memory_space<vmem>>, vector<8x128xf32>
    tpu.vector_store %arg5[%c0_40, %c0_41], %107 {strides = array<i32>} : memref<8x128xf32, #tpu.memory_space<vmem>>, vector<8x128xf32>,
    return
  }
}

</mosaic_0001>

<bundles_post_ra>
// kernel: cnn_forward.1
= control target key start
LH: loop header
LB: loop body
LE: loop exit
PB: predicated region body
PF: predicated region fallthrough
CT: control target
= control target key end

     0   :  { %v3257_v1 = vmov 0   ;;  %vm59_vm0 = vcmask 130048   ;;  %vm2648_vm1 = vcmask 1041408   ;;  %vm3259_vm2 = vmmov 0   ;;  %s3959_s1 = inlined_call_operand.vmem [shape: bf16[16,400], index: 1, kind: input, shape index: {}]   ;;  %s3960_s0 = inlined_call_operand.vmem [shape: bf16[192,16], index: 0, kind: input, shape index: {}]   ;;  %s3961_s2 = inlined_call_operand.vmem [shape: bf16[2400,20], index: 2, kind: input, shape index: {}]   ;;  %s3962_s3 = inlined_call_operand.vmem [shape: bf16[20,128], index: 3, kind: input, shape index: {}]   ;;  %s3963_s4 = inlined_call_operand.vmem [shape: f32[1,128], index: 4, kind: input, shape index: {}]   ;;  %s3964_s5 = inlined_call_operand.vmem [shape: f32[8,128], index: 5, kind: output, shape index: {}]  }
   0x1   :  { %v3079_v0 = vld [vmem:[%s3959_s1 + $0x4] ss:$16 sps:$4 sm:$0xff]   ;;  %98 = vmatprep.mubr.bf16.mxu0 %v3257_v1  ;;  %347 = vmatprep.mubr.bf16.mxu1 %v3257_v1  ;;  %v3081_v2 = vld [vmem:[%s3959_s1 + $0xc] ss:$16 sps:$4 sm:$0xff]   ;;  %v3083_v3 = vld [vmem:[%s3959_s1] ss:$16 sps:$4 sm:$0xff]  }
   0x2   :  { %66 = vmatprep.subr.bf16.mxu0 %v3079_v0  ;;  %v3084_v4 = vld [vmem:[%s3959_s1 + $0x8] ss:$16 sps:$4 sm:$0xff]   ;;  %315 = vmatprep.subr.bf16.mxu1 %v3081_v2  ;;  %v3085_v5 = vld [vmem:[%s3960_s0] sm:$0xff]   ;;  %v3086_v6 = vld [vmem:[%s3960_s0 + $0x10] sm:$0xff]   ;;  %vm2644_vm3 = vcmask 162816  }
   0x3   :  { %67 = vmatpush1.bf16.msra.mxu0 %v3083_v3  ;;  %316 = vmatpush1.bf16.msra.mxu1 %v3084_v4  ;;  %v3089_v7 = vld [vmem:[%s3961_s2 + $0x148] sm:$0xff]   ;;  %v3088_v9 = vld [vmem:[%s3960_s0 + $0x18] sm:$0xff]   ;;  %v3090_v10 = vld [vmem:[%s3961_s2 + $0x150] sm:$0xff]  }
   0x4   :  { %119 = vmatprep.subr.bf16.mxu0 %v3081_v2  ;;  %631 = vmatprep.subr.bf16.mxu1 %v3257_v1  ;;  %v3087_v8 = vld [vmem:[%s3960_s0 + $0x8] sm:$0xff]   ;;  %v3091_v11 = vld [vmem:[%s3961_s2 + $0x158] sm:$0xff]   ;;  %v3092_v12 = vld [vmem:[%s3961_s2 + $0x160] sm:$0xff]  }
   0x5   :  { %v3093_v13 = vld [vmem:[%s3961_s2 + $0x168] sm:$0xff]   ;;  %v3094_v14 = vld [vmem:[%s3961_s2 + $0x170] sm:$0xff]   ;;  %v3095_v15 = vld [vmem:[%s3961_s2 + $0x178] sm:$0xff]  }
   0x6   :  { %2713 = vmatmul.mubr.msk.bf16.vlgmr.msra.gmra.mrb[0].mxu0 %vm59_vm0, %v3085_v5  ;;  %2721 = vmatmul.mubr.msk.bf16.vlgmr.msra.gmra.mrb[0].mxu1 %vm59_vm0, %v3086_v6  ;;  %v3096_v16 = vld [vmem:[%s3961_s2 + $0x180] sm:$0xff]   ;;  %v3097_v17 = vld [vmem:[%s3961_s2 + $0x188] sm:$0xff]   ;;  %v3101_v20 = vld [vmem:[%s3961_s2 + $0x110] sm:$0xff]  }
   0x7   :  { %120 = vmatpush1.bf16.msra.mxu0 %v3084_v4  ;;  %108 = vmatprep.mubr.bf16.mxu0 %v3257_v1  ;;  %v3098_v18 = vld [vmem:[%s3961_s2 + $0x108] sm:$0xff]   ;;  %v3102_v21 = vld [vmem:[%s3961_s2 + $0xd0] sm:$0xff]   ;;  %v3104_v22 = vld [vmem:[%s3961_s2 + $0x118] sm:$0xff]  }
   0x8   :  { %357 = vmatprep.mubr.bf16.mxu1 %v3257_v1  ;;  %262 = vmatprep.subr.bf16.mxu0 %v3079_v0  ;;  %v3099_v19 = vld [vmem:[%s3961_s2 + $0xc8] sm:$0xff]   ;;  %v3105_v23 = vld [vmem:[%s3961_s2 + $0xd8] sm:$0xff]   ;;  %v3107_v24 = vld [vmem:[%s3961_s2 + $0x120] sm:$0xff]  }
   0x9   :  { %632 = vmatpush1.bf16.msra.mxu1 %v3089_v7  ;;  %v3108_v25 = vld [vmem:[%s3961_s2 + $0xe0] sm:$0xff]   ;;  %v3110_v26 = vld [vmem:[%s3961_s2 + $0x128] sm:$0xff]   ;;  %v3113_v28 = vld [vmem:[%s3961_s2 + $0x130] sm:$0xff]  }
   0xa   :  { %633 = vmatprep.subr.bf16.mxu1 %v3257_v1  ;;  %v3111_v27 = vld [vmem:[%s3961_s2 + $0xe8] sm:$0xff]   ;;  %v3114_v29 = vld [vmem:[%s3961_s2 + $0xf0] sm:$0xff]   ;;  %v3116_v30 = vld [vmem:[%s3961_s2 + $0x138] sm:$0xff]  }
   0xb   :  { %v3117_v31 = vld [vmem:[%s3961_s2 + $0xf8] sm:$0xff]   ;;  %v3119_v32 = vld [vmem:[%s3961_s2 + $0x140] sm:$0xff]  }
   0xc   :  { %v3120_v33 = vld [vmem:[%s3961_s2 + $0x100] sm:$0xff]  }
   0xd   :  { %634 = vmatpush1.bf16.msra.mxu1 %v3090_v10  ;;  %v3122_v34 = vld [vmem:[%s3961_s2 + $0x40] sm:$0xff]  }
   0xe   :  { %2714 = vmatmul.mubr.msk.bf16.gmra.mrb[4].mxu0 %vm59_vm0, %v3087_v8  ;;  %2722 = vmatmul.mubr.msk.bf16.gmra.mrb[4].mxu1 %vm59_vm0, %v3088_v9  ;;  %v3100_v7 = vld [vmem:[%s3961_s2 + $0x80] sm:$0xff]  }
   0xf   :  { %151 = vmatprep.mubr.bf16.mxu0 %v3257_v1  ;;  %635 = vmatprep.subr.bf16.mxu1 %v3257_v1 }
  0x11   :  { %636 = vmatpush1.bf16.msra.mxu1 %v3091_v11  ;;  %v3103_v11 = vld [vmem:[%s3961_s2 + $0x88] sm:$0xff]  }
  0x12   :  { %637 = vmatprep.subr.bf16.mxu1 %v3257_v1 }
  0x15   :  { %638 = vmatpush1.bf16.msra.mxu1 %v3092_v12 }
  0x16   :  { %2715 = vmatmul.mubr.msk.bf16.vlgmr.msra.gmra.mrb[8].mxu0 %vm59_vm0, %v3085_v5  ;;  %639 = vmatprep.subr.bf16.mxu1 %v3257_v1 }
  0x17   :  { %263 = vmatpush1.bf16.msra.mxu0 %v3083_v3  ;;  %161 = vmatprep.mubr.bf16.mxu0 %v3257_v1 }
  0x18   :  { %2907 = vmatprep.subr.bf16.mxu0 %v3098_v18 }
  0x19   :  { %640 = vmatpush1.bf16.msra.mxu1 %v3093_v13 }
  0x1a   :  { %641 = vmatprep.subr.bf16.mxu1 %v3257_v1 }
  0x1d   :  { %642 = vmatpush1.bf16.msra.mxu1 %v3094_v14 }
  0x1e   :  { %2716 = vmatmul.mubr.msk.bf16.gmra.mrb[12].mxu0 %vm59_vm0, %v3087_v8  ;;  %643 = vmatprep.subr.bf16.mxu1 %v3257_v1 }
  0x1f   :  { %294 = vmatprep.mubr.bf16.mxu0 %v3257_v1 }
  0x21   :  { %644 = vmatpush1.bf16.msra.mxu1 %v3095_v15  ;;  %v3106_v15 = vld [vmem:[%s3961_s2 + $0x90] sm:$0xff]  }
  0x22   :  { %645 = vmatprep.subr.bf16.mxu1 %v3257_v1 }
  0x25   :  { %646 = vmatpush1.bf16.msra.mxu1 %v3096_v16 }
  0x26   :  { %2719 = vmatmul.mubr.msk.bf16.vlgmr.msra.gmra.mrb[16].mxu0 %vm59_vm0, %v3086_v6  ;;  %647 = vmatprep.subr.bf16.mxu1 %v3257_v1 }
  0x27   :  { %304 = vmatprep.mubr.bf16.mxu0 %v3257_v1  ;;  %2908 = vmatpush3.bf16.msra.mxu0 %v3099_v19 }
  0x28   :  { %2909 = vmatprep.subr.bf16.mxu0 %v3101_v20 }
  0x29   :  { %648 = vmatpush1.bf16.msra.mxu1 %v3097_v17 }
  0x2a   :  { %864 = vmatprep.subr.bf16.mxu1 %v3257_v1 }
  0x2b   :  { %2910 = vmatpush3.bf16.msra.mxu0 %v3102_v21  ;;  %v3109_v21 = vld [vmem:[%s3961_s2 + $0x98] sm:$0xff]  }
  0x2c   :  { %2911 = vmatprep.subr.bf16.mxu0 %v3104_v22 }
  0x2e   :  { %2720 = vmatmul.mubr.msk.bf16.gmra.mrb[20].mxu0 %vm59_vm0, %v3088_v9 }
  0x2f   :  { %2912 = vmatpush3.bf16.msra.mxu0 %v3105_v23 }
  0x30   :  { %2913 = vmatprep.subr.bf16.mxu0 %v3107_v24 }
  0x33   :  { %2914 = vmatpush3.bf16.msra.mxu0 %v3108_v25 }
  0x34   :  { %2915 = vmatprep.subr.bf16.mxu0 %v3110_v26 }
  0x37   :  { %2916 = vmatpush3.bf16.msra.mxu0 %v3111_v27  ;;  %v3112_v27 = vld [vmem:[%s3961_s2 + $0xa0] sm:$0xff]  }
  0x38   :  { %2917 = vmatprep.subr.bf16.mxu0 %v3113_v28 }
  0x3b   :  { %2918 = vmatpush3.bf16.msra.mxu0 %v3114_v29 }
  0x3c   :  { %2919 = vmatprep.subr.bf16.mxu0 %v3116_v30 }
  0x3f   :  { %2920 = vmatpush3.bf16.msra.mxu0 %v3117_v31  ;;  %v3115_v31 = vld [vmem:[%s3961_s2 + $0xa8] sm:$0xff]  }
  0x40   :  { %2921 = vmatprep.subr.bf16.mxu0 %v3119_v32 }
  0x43   :  { %2922 = vmatpush3.bf16.msra.mxu0 %v3120_v33 }
  0x44   :  { %2929 = vmatprep.subr.bf16.mxu0 %v3122_v34 }
  0xd9   :  { %v100_v35 = vpop.f32.mrb[0].mxu0  ;;  %v349_v36 = vpop.f32.mrb[0].mxu1 }
  0xda   :  { %v102_v37 = vpop.f32.mrb[1].mxu0  ;;  %v351_v38 = vpop.f32.mrb[1].mxu1 }
  0xdb   :  { %v104_v39 = vpop.f32.mrb[2].mxu0  ;;  %v353_v40 = vpop.f32.mrb[2].mxu1 }
  0xdc   :  { %v172_v41 = vmax.f32 %v100_v35, %v104_v39  ;;  %v106_v42 = vpop.f32.mrb[3].mxu0  ;;  %v370_v43 = vmax.f32 %v349_v36, %v353_v40  ;;  %v355_v44 = vpop.f32.mrb[3].mxu1  ;;  %v3118_v35 = vld [vmem:[%s3961_s2 + $0xb0] sm:$0xff]  }
  0xdd   :  { %v173_v45 = vmax.f32 %v102_v37, %v106_v42  ;;  %v371_v46 = vmax.f32 %v351_v38, %v355_v44 }
  0xe1   :  { %v110_v47 = vpop.f32.mrb[4].mxu0  ;;  %v359_v48 = vpop.f32.mrb[4].mxu1 }
  0xe2   :  { %v112_v49 = vpop.f32.mrb[5].mxu0  ;;  %v361_v50 = vpop.f32.mrb[5].mxu1 }
  0xe3   :  { %v114_v51 = vpop.f32.mrb[6].mxu0  ;;  %v363_v52 = vpop.f32.mrb[6].mxu1 }
  0xe4   :  { %v176_v53 = vmax.f32 %v110_v47, %v114_v51  ;;  %v374_v54 = vmax.f32 %v359_v48, %v363_v52  ;;  %v116_v55 = vpop.f32.mrb[7].mxu0  ;;  %v365_v56 = vpop.f32.mrb[7].mxu1  ;;  %v3124_v47 = vld [vmem:[%s3961_s2 + $0xc0] sm:$0xff]   ;;  %v3126_v52 = vld [vmem:[%s3961_s2 + $0x8] sm:$0xff]  }
  0xe5   :  { %v177_v57 = vmax.f32 %v112_v49, %v116_v55  ;;  %v375_v58 = vmax.f32 %v361_v50, %v365_v56  ;;  %v3125_v50 = vld [vmem:[%s3961_s2 + $0x48] sm:$0xff]   ;;  %v3128_v56 = vld [vmem:[%s3961_s2 + $0x10] sm:$0xff]  }
  0xe6   :  { %v3418_v59 = vmax.f32 %v172_v41, %v176_v53  ;;  %v378_v60 = vmax.f32 %v370_v43, %v374_v54  ;;  %v3121_v41 = vld [vmem:[%s3961_s2 + $0xb8] sm:$0xff]   ;;  %v3127_v54 = vld [vmem:[%s3961_s2 + $0x50] sm:$0xff]  }
  0xe7   :  { %v3420_v61 = vmax.f32 %v173_v45, %v177_v57  ;;  %v379_v62 = vmax.f32 %v371_v46, %v375_v58  ;;  %v3123_v46 = vld [vmem:[%s3961_s2] sm:$0xff]   ;;  %v3475_v55 = vld [vmem:[%s3959_s1 + $0xc] ss:$16 sps:$4 sm:$0xff]   ;;  %v3484_v57 = vld [vmem:[%s3959_s1 + $0x8] ss:$16 sps:$4 sm:$0xff]  }
  0xe8   :  { %v382_v63 = vmax.f32 %v378_v60, 0.0  ;;  %v3129_v58 = vld [vmem:[%s3961_s2 + $0x58] sm:$0xff]  }
  0xe9   :  { %v383_v0 = vmax.f32 %v379_v62, 0.0  ;;  %v153_v2 = vpop.f32.mrb[8].mxu0  ;;  %v185_v44 = vmax.f32 %v3420_v61, 0.0  ;;  %v3130_v60 = vld [vmem:[%s3961_s2 + $0x18] sm:$0xff]   ;;  %v3131_v61 = vld [vmem:[%s3961_s2 + $0x60] sm:$0xff]  }
  0xea   :  { %v386_v3 = vpack.c.bf16 %v382_v63, %v382_v63  ;;  %v155_v4 = vpop.f32.mrb[9].mxu0  ;;  %v3139_v62 = vld [vmem:[%s3960_s0 + $0x20] sm:$0xff]  }
  0xeb   :  { %v387_v5 = vpack.c.bf16 %v383_v0, %v383_v0  ;;  %v157_v6 = vpop.f32.mrb[10].mxu0  ;;  %v189_v51 = vpack.c.bf16 %v185_v44, %v185_v44  ;;  %v3132_v63 = vld [vmem:[%s3961_s2 + $0x20] sm:$0xff]   ;;  %v3133_v0 = vld [vmem:[%s3961_s2 + $0x68] sm:$0xff]  }
  0xec   :  { %v174_v8 = vmax.f32 %v153_v2, %v157_v6  ;;  %v159_v9 = vpop.f32.mrb[11].mxu0  ;;  %v3134_v2 = vld [vmem:[%s3961_s2 + $0x28] sm:$0xff]   ;;  %v3137_v6 = vld [vmem:[%s3961_s2 + $0x78] sm:$0xff]  }
  0xed   :  { %v175_v10 = vmax.f32 %v155_v4, %v159_v9  ;;  %2748 = vmatprep.mubr.msk.bf16.mxu1 %vm59_vm0, %v387_v5  ;;  %v3140_v4 = vld [vmem:[%s3960_s0 + $0x28] sm:$0xff]   ;;  %v3136_v5 = vld [vmem:[%s3961_s2 + $0x30] sm:$0xff]  }
  0xee   :  { %664 = vmatmul.mubr.bf16.vlgmr.msra.gmra.mrb[8].mxu1 %v386_v3  ;;  %v3135_v3 = vld [vmem:[%s3961_s2 + $0x70] sm:$0xff]  }
  0xef   :  { %865 = vmatpush1.bf16.msra.mxu1 %v3100_v7  ;;  %v3138_v7 = vld [vmem:[%s3961_s2 + $0x38] sm:$0xff]  }
  0xf0   :  { %866 = vmatprep.subr.bf16.mxu1 %v3257_v1 }
  0xf1   :  { %v163_v12 = vpop.f32.mrb[12].mxu0 }
  0xf2   :  { %v165_v13 = vpop.f32.mrb[13].mxu0 }
  0xf3   :  { %867 = vmatpush1.bf16.msra.mxu1 %v3103_v11  ;;  %v167_v14 = vpop.f32.mrb[14].mxu0  ;;  %v3538_v11 = vld [vmem:[%s3959_s1] ss:$16 sps:$4 sm:$0xff]  }
  0xf4   :  { %v178_v16 = vmax.f32 %v163_v12, %v167_v14  ;;  %v169_v17 = vpop.f32.mrb[15].mxu0  ;;  %868 = vmatprep.subr.bf16.mxu1 %v3257_v1  ;;  %v3142_v12 = vld [vmem:[%s3961_s2 + $0x190] sm:$0xff]   ;;  %v3144_v14 = vld [vmem:[%s3961_s2 + $0x198] sm:$0xff]  }
  0xf5   :  { %v179_v18 = vmax.f32 %v165_v13, %v169_v17  ;;  %v3143_v13 = vld [vmem:[%s3961_s2 + $0x1d8] sm:$0xff]   ;;  %v3147_v17 = vld [vmem:[%s3961_s2 + $0x1e8] sm:$0xff]  }
  0xf6   :  { %v182_v19 = vmax.f32 %v174_v8, %v178_v16  ;;  %v184_v8 = vmax.f32 %v3418_v59, 0.0  ;;  %v3141_v59 = vld [vmem:[%s3961_s2 + $0x1d0] sm:$0xff]   ;;  %v3146_v16 = vld [vmem:[%s3961_s2 + $0x1a0] sm:$0xff]  }
  0xf7   :  { %v183_v20 = vmax.f32 %v175_v10, %v179_v18  ;;  %869 = vmatpush1.bf16.msra.mxu1 %v3106_v15  ;;  %v3532_v10 = vld [vmem:[%s3959_s1 + $0x4] ss:$16 sps:$4 sm:$0xff]   ;;  %v3148_v18 = vld [vmem:[%s3961_s2 + $0x1a8] sm:$0xff]  }
  0xf8   :  { %870 = vmatprep.subr.bf16.mxu1 %v3257_v1  ;;  %v186_v48 = vmax.f32 %v182_v19, 0.0  ;;  %v188_v9 = vpack.c.bf16 %v184_v8, %v184_v8  ;;  %v3145_v15 = vld [vmem:[%s3961_s2 + $0x1e0] sm:$0xff]   ;;  %v3149_v19 = vld [vmem:[%s3961_s2 + $0x1f0] sm:$0xff]  }
  0xf9   :  { %v187_v22 = vmax.f32 %v183_v20, 0.0  ;;  %v296_v23 = vpop.f32.mrb[16].mxu0  ;;  %v3150_v20 = vld [vmem:[%s3961_s2 + $0x1b0] sm:$0xff]  }
  0xfa   :  { %v298_v24 = vpop.f32.mrb[17].mxu0  ;;  %v190_v53 = vpack.c.bf16 %v186_v48, %v186_v48 }
  0xfb   :  { %v191_v25 = vpack.c.bf16 %v187_v22, %v187_v22  ;;  %871 = vmatpush1.bf16.msra.mxu1 %v3109_v21  ;;  %v300_v26 = vpop.f32.mrb[18].mxu0  ;;  %v3151_v21 = vld [vmem:[%s3961_s2 + $0x1f8] sm:$0xff]  }
  0xfc   :  { %v368_v28 = vmax.f32 %v296_v23, %v300_v26  ;;  %v302_v29 = vpop.f32.mrb[19].mxu0  ;;  %872 = vmatprep.subr.bf16.mxu1 %v3257_v1  ;;  %v3152_v22 = vld [vmem:[%s3961_s2 + $0x1b8] sm:$0xff]   ;;  %v3153_v23 = vld [vmem:[%s3961_s2 + $0x200] sm:$0xff]   ;;  %v3156_v26 = vld [vmem:[%s3961_s2 + $0x1c8] sm:$0xff]  }
  0xfd   :  { %v369_v30 = vmax.f32 %v298_v24, %v302_v29  ;;  %2774 = vmatprep.mubr.msk.bf16.mxu1 %vm59_vm0, %v191_v25  ;;  %v3154_v24 = vld [vmem:[%s3961_s2 + $0x1c0] sm:$0xff]   ;;  %v3155_v25 = vld [vmem:[%s3961_s2 + $0x208] sm:$0xff]  }
  0xfe   :  { %v3161_v29 = vld [vmem:[%s3961_s2 + $0x220] sm:$0xff]  }
  0xff   :  { %873 = vmatpush1.bf16.msra.mxu1 %v3112_v27  ;;  %v3159_v27 = vld [vmem:[%s3961_s2 + $0x210] sm:$0xff]  }
 0x100   :  { %874 = vmatprep.subr.bf16.mxu1 %v3257_v1 }
 0x101   :  { %v306_v32 = vpop.f32.mrb[20].mxu0 }
 0x102   :  { %v308_v33 = vpop.f32.mrb[21].mxu0 }
 0x103   :  { %875 = vmatpush1.bf16.msra.mxu1 %v3115_v31  ;;  %v310_v34 = vpop.f32.mrb[22].mxu0  ;;  %v3163_v31 = vld [vmem:[%s3961_s2 + $0x230] sm:$0xff]  }
 0x104   :  { %v372_v36 = vmax.f32 %v306_v32, %v310_v34  ;;  %v312_v37 = vpop.f32.mrb[23].mxu0  ;;  %876 = vmatprep.subr.bf16.mxu1 %v3257_v1  ;;  %v3164_v32 = vld [vmem:[%s3961_s2 + $0x238] sm:$0xff]   ;;  %v3166_v34 = vld [vmem:[%s3961_s2 + $0x248] sm:$0xff]  }
 0x105   :  { %v373_v38 = vmax.f32 %v308_v33, %v312_v37  ;;  %v3165_v33 = vld [vmem:[%s3961_s2 + $0x240] sm:$0xff]  }
 0x106   :  { %v376_v39 = vmax.f32 %v368_v28, %v372_v36  ;;  %v3160_v28 = vld [vmem:[%s3961_s2 + $0x218] sm:$0xff]  }
 0x107   :  { %v377_v40 = vmax.f32 %v369_v30, %v373_v38  ;;  %877 = vmatpush1.bf16.msra.mxu1 %v3118_v35  ;;  %v3162_v30 = vld [vmem:[%s3961_s2 + $0x228] sm:$0xff]   ;;  %v3167_v35 = vld [vmem:[%s3961_s2 + $0x250] sm:$0xff]  }
 0x108   :  { %v380_v42 = vmax.f32 %v376_v39, 0.0  ;;  %878 = vmatprep.subr.bf16.mxu1 %v3257_v1 }
 0x109   :  { %v381_v43 = vmax.f32 %v377_v40, 0.0 }
 0x10a   :  { %v384_v49 = vpack.c.bf16 %v380_v42, %v380_v42 }
 0x10b   :  { %v385_v45 = vpack.c.bf16 %v381_v43, %v381_v43  ;;  %879 = vmatpush1.bf16.msra.mxu1 %v3121_v41 }
 0x10c   :  { %880 = vmatprep.subr.bf16.mxu1 %v3257_v1 }
 0x10d   :  { %623 = vmatprep.mubr.bf16.mxu0 %v385_v45 }
 0x10e   :  { %624 = vmatmul.mubr.bf16.vlgmr.msra.gmra.mrb[24].mxu0 %v384_v49 }
 0x10f   :  { %2930 = vmatpush3.bf16.msra.mxu0 %v3123_v46  ;;  %881 = vmatpush1.bf16.msra.mxu1 %v3124_v47 }
 0x110   :  { %856 = vmatprep.mubr.bf16.mxu0 %v189_v51  ;;  %2931 = vmatprep.subr.bf16.mxu0 %v3125_v50 }
 0x111   :  { %977 = vmatprep.subr.bf16.mxu1 %v3475_v55 }
 0x112   :  { %897 = vmatmul.mubr.bf16.vlgmr.msra.gmra.mrb[8].mxu1 %v190_v53 }
 0x113   :  { %2932 = vmatpush3.bf16.msra.mxu0 %v3126_v52  ;;  %978 = vmatpush1.bf16.msra.mxu1 %v3484_v57 }
 0x114   :  { %2933 = vmatprep.subr.bf16.mxu0 %v3127_v54  ;;  %1009 = vmatprep.mubr.bf16.mxu1 %v3257_v1 }
 0x115   :  { %1293 = vmatprep.subr.bf16.mxu1 %v3257_v1 }
 0x117   :  { %2934 = vmatpush3.bf16.msra.mxu0 %v3128_v56 }
 0x118   :  { %2935 = vmatprep.subr.bf16.mxu0 %v3129_v58 }
 0x11a   :  { %2779 = vmatmul.mubr.msk.bf16.vlgmr.msra.gmra.mrb[12].mxu1 %vm59_vm0, %v3139_v62 }
 0x11b   :  { %2936 = vmatpush3.bf16.msra.mxu0 %v3130_v60  ;;  %1019 = vmatprep.mubr.bf16.mxu1 %v3257_v1 }
 0x11c   :  { %2937 = vmatprep.subr.bf16.mxu0 %v3131_v61  ;;  %1294 = vmatpush1.bf16.msra.mxu1 %v3159_v27  ;;  %v3169_v27 = vld [vmem:[%s3961_s2 + $0x258] sm:$0xff]  }
 0x11d   :  { %1295 = vmatprep.subr.bf16.mxu1 %v3257_v1 }
 0x11f   :  { %2938 = vmatpush3.bf16.msra.mxu0 %v3132_v63 }
 0x120   :  { %2939 = vmatprep.subr.bf16.mxu0 %v3133_v0  ;;  %1296 = vmatpush1.bf16.msra.mxu1 %v3160_v28  ;;  %v3170_v28 = vld [vmem:[%s3961_s2 + $0x2a0] sm:$0xff]  }
 0x121   :  { %1297 = vmatprep.subr.bf16.mxu1 %v3257_v1 }
 0x122   :  { %2780 = vmatmul.mubr.msk.bf16.gmra.mrb[16].mxu1 %vm59_vm0, %v3140_v4 }
 0x123   :  { %2940 = vmatpush3.bf16.msra.mxu0 %v3134_v2 }
 0x124   :  { %2941 = vmatprep.subr.bf16.mxu0 %v3135_v3  ;;  %1298 = vmatpush1.bf16.msra.mxu1 %v3161_v29  ;;  %v3171_v29 = vld [vmem:[%s3961_s2 + $0x260] sm:$0xff]  }
 0x125   :  { %1299 = vmatprep.subr.bf16.mxu1 %v3257_v1 }
 0x127   :  { %2942 = vmatpush3.bf16.msra.mxu0 %v3136_v5  ;;  %v3157_v5 = vld [vmem:[%s3960_s0 + $0x30] sm:$0xff]  }
 0x128   :  { %2943 = vmatprep.subr.bf16.mxu0 %v3137_v6  ;;  %1300 = vmatpush1.bf16.msra.mxu1 %v3162_v30  ;;  %v3172_v30 = vld [vmem:[%s3961_s2 + $0x2a8] sm:$0xff]  }
 0x129   :  { %1301 = vmatprep.subr.bf16.mxu1 %v3257_v1 }
 0x12b   :  { %2944 = vmatpush3.bf16.msra.mxu0 %v3138_v7 }
 0x12c   :  { %924 = vmatprep.subr.bf16.mxu0 %v3532_v10  ;;  %1302 = vmatpush1.bf16.msra.mxu1 %v3163_v31  ;;  %v3173_v31 = vld [vmem:[%s3961_s2 + $0x268] sm:$0xff]  }
 0x12d   :  { %1303 = vmatprep.subr.bf16.mxu1 %v3257_v1 }
 0x12e   :  { %857 = vmatmul.mubr.bf16.vlgmr.msra.gmra.mrb[28].mxu0 %v188_v9 }
 0x12f   :  { %925 = vmatpush1.bf16.msra.mxu0 %v3538_v11  ;;  %956 = vmatprep.mubr.bf16.mxu0 %v3257_v1 }
 0x130   :  { %2951 = vmatprep.subr.bf16.mxu0 %v3141_v59  ;;  %1304 = vmatpush1.bf16.msra.mxu1 %v3164_v32  ;;  %v3174_v32 = vld [vmem:[%s3961_s2 + $0x2b0] sm:$0xff]  }
 0x131   :  { %1305 = vmatprep.subr.bf16.mxu1 %v3257_v1 }
 0x134   :  { %1306 = vmatpush1.bf16.msra.mxu1 %v3165_v33  ;;  %v3175_v33 = vld [vmem:[%s3961_s2 + $0x270] sm:$0xff]  }
 0x135   :  { %1307 = vmatprep.subr.bf16.mxu1 %v3257_v1 }
 0x136   :  { %2777 = vmatmul.mubr.msk.bf16.vlgmr.msra.gmra.mrb[32].mxu0 %vm59_vm0, %v3139_v62 }
 0x137   :  { %966 = vmatprep.mubr.bf16.mxu0 %v3257_v1  ;;  %2952 = vmatpush3.bf16.msra.mxu0 %v3142_v12 }
 0x138   :  { %2953 = vmatprep.subr.bf16.mxu0 %v3143_v13  ;;  %1308 = vmatpush1.bf16.msra.mxu1 %v3166_v34  ;;  %v3158_v13 = vld [vmem:[%s3960_s0 + $0x38] sm:$0xff]  }
 0x139   :  { %1309 = vmatprep.subr.bf16.mxu1 %v3257_v1  ;;  %v3176_v34 = vld [vmem:[%s3961_s2 + $0x2b8] sm:$0xff]  }
 0x13b   :  { %2954 = vmatpush3.bf16.msra.mxu0 %v3144_v14 }
 0x13c   :  { %2955 = vmatprep.subr.bf16.mxu0 %v3145_v15  ;;  %1310 = vmatpush1.bf16.msra.mxu1 %v3167_v35  ;;  %v3177_v35 = vld [vmem:[%s3961_s2 + $0x278] sm:$0xff]  }
 0x13d   :  { %1407 = vmatprep.subr.bf16.mxu1 %v3475_v55 }
 0x13e   :  { %2778 = vmatmul.mubr.msk.bf16.gmra.mrb[36].mxu0 %vm59_vm0, %v3140_v4 }
 0x13f   :  { %2956 = vmatpush3.bf16.msra.mxu0 %v3146_v16 }
 0x140   :  { %2957 = vmatprep.subr.bf16.mxu0 %v3147_v17 }
 0x143   :  { %2958 = vmatpush3.bf16.msra.mxu0 %v3148_v18 }
 0x144   :  { %2959 = vmatprep.subr.bf16.mxu0 %v3149_v19 }
 0x147   :  { %2960 = vmatpush3.bf16.msra.mxu0 %v3150_v20 }
 0x148   :  { %2961 = vmatprep.subr.bf16.mxu0 %v3151_v21 }
 0x14b   :  { %2962 = vmatpush3.bf16.msra.mxu0 %v3152_v22 }
 0x14c   :  { %2963 = vmatprep.subr.bf16.mxu0 %v3153_v23 }
 0x14f   :  { %2964 = vmatpush3.bf16.msra.mxu0 %v3154_v24 }
 0x150   :  { %2965 = vmatprep.subr.bf16.mxu0 %v3155_v25 }
 0x153   :  { %2966 = vmatpush3.bf16.msra.mxu0 %v3156_v26  ;;  %v3168_v26 = vld [vmem:[%s3961_s2 + $0x298] sm:$0xff]  }
 0x154   :  { %1354 = vmatprep.subr.bf16.mxu0 %v3532_v10 }
 0x1e1   :  { %v2923_v36 = vpop.f32.mrb[24].mxu0 }
 0x1e2   :  { %v2924_v37 = vpop.f32.mrb[25].mxu0 }
 0x1e3   :  { %v2925_v38 = vadd.f32 %v2924_v37, %v2923_v36  ;;  %v2926_v39 = vpop.f32.mrb[26].mxu0  ;;  %v3178_v36 = vld [vmem:[%s3961_s2 + $0x2c0] sm:$0xff]  }
 0x1e4   :  { %v2927_v40 = vpop.f32.mrb[27].mxu0  ;;  %v3179_v37 = vld [vmem:[%s3961_s2 + $0x280] sm:$0xff]   ;;  %v3181_v39 = vld [vmem:[%s3961_s2 + $0x288] sm:$0xff]  }
 0x1e5   :  { %v3182_v40 = vld [vmem:[%s3961_s2 + $0x2d0] sm:$0xff]  }
 0x1ed   :  { %v1011_v41 = vpop.f32.mrb[12].mxu1 }
 0x1ee   :  { %v1013_v42 = vpop.f32.mrb[13].mxu1 }
 0x1ef   :  { %v1015_v43 = vpop.f32.mrb[14].mxu1 }
 0x1f0   :  { %v1032_v44 = vmax.f32 %v1011_v41, %v1015_v43  ;;  %v1017_v45 = vpop.f32.mrb[15].mxu1  ;;  %v3183_v41 = vld [vmem:[%s3961_s2 + $0x290] sm:$0xff]   ;;  %v3189_v43 = vld [vmem:[%s3961_s2 + $0x2e0] sm:$0xff]  }
 0x1f1   :  { %v1033_v46 = vmax.f32 %v1013_v42, %v1017_v45  ;;  %v3188_v42 = vld [vmem:[%s3961_s2 + $0x2d8] sm:$0xff]   ;;  %v3191_v45 = vld [vmem:[%s3961_s2 + $0x2f0] sm:$0xff]  }
 0x1f5   :  { %v1021_v47 = vpop.f32.mrb[16].mxu1 }
 0x1f6   :  { %v1023_v48 = vpop.f32.mrb[17].mxu1 }
 0x1f7   :  { %v1025_v49 = vpop.f32.mrb[18].mxu1 }
 0x1f8   :  { %v1036_v50 = vmax.f32 %v1021_v47, %v1025_v49  ;;  %v1027_v51 = vpop.f32.mrb[19].mxu1 }
 0x1f9   :  { %v1037_v52 = vmax.f32 %v1023_v48, %v1027_v51  ;;  %v3193_v51 = vld [vmem:[%s3961_s2 + $0x300] sm:$0xff]  }
 0x1fa   :  { %v1040_v53 = vmax.f32 %v1032_v44, %v1036_v50  ;;  %v3190_v44 = vld [vmem:[%s3961_s2 + $0x2e8] sm:$0xff]  }
 0x1fb   :  { %v1041_v54 = vmax.f32 %v1033_v46, %v1037_v52  ;;  %v3192_v46 = vld [vmem:[%s3961_s2 + $0x2f8] sm:$0xff]  }
 0x1fc   :  { %v1044_v56 = vmax.f32 %v1040_v53, 0.0 }
 0x1fd   :  { %v1045_v58 = vmax.f32 %v1041_v54, 0.0  ;;  %v3194_v54 = vld [vmem:[%s3961_s2 + $0x308] sm:$0xff]  }
 0x1fe   :  { %v1048_v60 = vpack.c.bf16 %v1044_v56, %v1044_v56 }
 0x1ff   :  { %v1049_v61 = vpack.c.bf16 %v1045_v58, %v1045_v58 }
 0x201   :  { %v2945_v62 = vpop.f32.mrb[28].mxu0  ;;  %2806 = vmatprep.mubr.msk.bf16.mxu1 %vm59_vm0, %v1049_v61 }
 0x202   :  { %v2946_v63 = vpop.f32.mrb[29].mxu0  ;;  %1326 = vmatmul.mubr.bf16.vlgmr.msra.gmra.mrb[8].mxu1 %v1048_v60 }
 0x203   :  { %v2947_v0 = vadd.f32 %v2946_v63, %v2945_v62  ;;  %v2948_v2 = vpop.f32.mrb[30].mxu0  ;;  %1408 = vmatpush1.bf16.msra.mxu1 %v3484_v57  ;;  %1439 = vmatprep.mubr.bf16.mxu1 %v3257_v1  ;;  %v3195_v63 = vld [vmem:[%s3961_s2 + $0x310] sm:$0xff]  }
 0x204   :  { %v2949_v3 = vpop.f32.mrb[31].mxu0  ;;  %1723 = vmatprep.subr.bf16.mxu1 %v3257_v1 }
 0x205   :  { %v3634_v4 = vadd.f32 %v2947_v0, %v2925_v38  ;;  %v3180_v38 = vld [vmem:[%s3961_s2 + $0x2c8] sm:$0xff]  }
 0x209   :  { %v958_v6 = vpop.f32.mrb[32].mxu0 }
 0x20a   :  { %v960_v7 = vpop.f32.mrb[33].mxu0  ;;  %2811 = vmatmul.mubr.msk.bf16.vlgmr.msra.gmra.mrb[20].mxu1 %vm59_vm0, %v3157_v5 }
 0x20b   :  { %v962_v8 = vpop.f32.mrb[34].mxu0  ;;  %1449 = vmatprep.mubr.bf16.mxu1 %v3257_v1  ;;  %1724 = vmatpush1.bf16.msra.mxu1 %v3188_v42  ;;  %v3205_v42 = vld [vmem:[%s3961_s2 + $0x380] sm:$0xff]  }
 0x20c   :  { %v1030_v9 = vmax.f32 %v958_v6, %v962_v8  ;;  %v964_v59 = vpop.f32.mrb[35].mxu0  ;;  %1725 = vmatprep.subr.bf16.mxu1 %v3257_v1  ;;  %v3196_v6 = vld [vmem:[%s3961_s2 + $0x318] sm:$0xff]   ;;  %v3197_v8 = vld [vmem:[%s3961_s2 + $0x360] sm:$0xff]  }
 0x20d   :  { %v1031_v12 = vmax.f32 %v960_v7, %v964_v59 }
 0x20f   :  { %1726 = vmatpush1.bf16.msra.mxu1 %v3189_v43  ;;  %v3206_v43 = vld [vmem:[%s3961_s2 + $0x340] sm:$0xff]  }
 0x210   :  { %1727 = vmatprep.subr.bf16.mxu1 %v3257_v1 }
 0x211   :  { %v968_v14 = vpop.f32.mrb[36].mxu0 }
 0x212   :  { %v970_v15 = vpop.f32.mrb[37].mxu0  ;;  %2812 = vmatmul.mubr.msk.bf16.gmra.mrb[24].mxu1 %vm59_vm0, %v3158_v13 }
 0x213   :  { %v972_v16 = vpop.f32.mrb[38].mxu0  ;;  %1728 = vmatpush1.bf16.msra.mxu1 %v3190_v44  ;;  %v3207_v44 = vld [vmem:[%s3961_s2 + $0x388] sm:$0xff]  }
 0x214   :  { %v1034_v17 = vmax.f32 %v968_v14, %v972_v16  ;;  %v974_v18 = vpop.f32.mrb[39].mxu0  ;;  %1729 = vmatprep.subr.bf16.mxu1 %v3257_v1 }
 0x215   :  { %v1035_v19 = vmax.f32 %v970_v15, %v974_v18 }
 0x216   :  { %v1038_v20 = vmax.f32 %v1030_v9, %v1034_v17 }
 0x217   :  { %v1039_v21 = vmax.f32 %v1031_v12, %v1035_v19  ;;  %1730 = vmatpush1.bf16.msra.mxu1 %v3191_v45  ;;  %v3198_v12 = vld [vmem:[%s3961_s2 + $0x320] sm:$0xff]   ;;  %v3208_v45 = vld [vmem:[%s3961_s2 + $0x348] sm:$0xff]  }
 0x218   :  { %v1042_v22 = vmax.f32 %v1038_v20, 0.0  ;;  %1731 = vmatprep.subr.bf16.mxu1 %v3257_v1 }
 0x219   :  { %v1043_v23 = vmax.f32 %v1039_v21, 0.0 }
 0x21a   :  { %v1046_v25 = vpack.c.bf16 %v1042_v22, %v1042_v22 }
 0x21b   :  { %v1047_v24 = vpack.c.bf16 %v1043_v23, %v1043_v23  ;;  %1732 = vmatpush1.bf16.msra.mxu1 %v3192_v46  ;;  %v3209_v46 = vld [vmem:[%s3961_s2 + $0x390] sm:$0xff]  }
 0x21c   :  { %1733 = vmatprep.subr.bf16.mxu1 %v3257_v1 }
 0x21d   :  { %1285 = vmatprep.mubr.bf16.mxu0 %v1047_v24 }
 0x21e   :  { %1286 = vmatmul.mubr.bf16.vlgmr.msra.gmra.mrb[40].mxu0 %v1046_v25 }
 0x21f   :  { %1355 = vmatpush1.bf16.msra.mxu0 %v3538_v11  ;;  %1386 = vmatprep.mubr.bf16.mxu0 %v3257_v1 }
 0x220   :  { %2973 = vmatprep.subr.bf16.mxu0 %v3168_v26  ;;  %1734 = vmatpush1.bf16.msra.mxu1 %v3193_v51  ;;  %v3215_v51 = vld [vmem:[%s3961_s2 + $0x3e8] sm:$0xff]  }
 0x221   :  { %1735 = vmatprep.subr.bf16.mxu1 %v3257_v1 }
 0x224   :  { %1736 = vmatpush1.bf16.msra.mxu1 %v3194_v54  ;;  %v3220_v54 = vld [vmem:[%s3961_s2 + $0x438] sm:$0xff]  }
 0x225   :  { %1737 = vmatprep.subr.bf16.mxu1 %v3257_v1 }
 0x226   :  { %2809 = vmatmul.mubr.msk.bf16.vlgmr.msra.gmra.mrb[44].mxu0 %vm59_vm0, %v3157_v5 }
 0x227   :  { %1396 = vmatprep.mubr.bf16.mxu0 %v3257_v1  ;;  %2974 = vmatpush3.bf16.msra.mxu0 %v3169_v27 }
 0x228   :  { %2975 = vmatprep.subr.bf16.mxu0 %v3170_v28  ;;  %1738 = vmatpush1.bf16.msra.mxu1 %v3195_v63  ;;  %v3229_v63 = vld [vmem:[%s3961_s2 + $0x450] sm:$0xff]  }
 0x229   :  { %1739 = vmatprep.subr.bf16.mxu1 %v3257_v1 }
 0x22b   :  { %2976 = vmatpush3.bf16.msra.mxu0 %v3171_v29 }
 0x22c   :  { %2977 = vmatprep.subr.bf16.mxu0 %v3172_v30  ;;  %1740 = vmatpush1.bf16.msra.mxu1 %v3196_v6  ;;  %v3236_v6 = vld [vmem:[%s3961_s2 + $0x420] sm:$0xff]  }
 0x22d   :  { %2995 = vmatprep.subr.bf16.mxu1 %v3197_v8 }
 0x22e   :  { %2810 = vmatmul.mubr.msk.bf16.gmra.mrb[48].mxu0 %vm59_vm0, %v3158_v13 }
 0x22f   :  { %2978 = vmatpush3.bf16.msra.mxu0 %v3173_v31 }
 0x230   :  { %2979 = vmatprep.subr.bf16.mxu0 %v3174_v32 }
 0x233   :  { %2980 = vmatpush3.bf16.msra.mxu0 %v3175_v33 }
 0x234   :  { %2981 = vmatprep.subr.bf16.mxu0 %v3176_v34 }
 0x237   :  { %2982 = vmatpush3.bf16.msra.mxu0 %v3177_v35 }
 0x238   :  { %2983 = vmatprep.subr.bf16.mxu0 %v3178_v36 }
 0x23b   :  { %2984 = vmatpush3.bf16.msra.mxu0 %v3179_v37  ;;  %v3185_v37 = vld [vmem:[%s3960_s0 + $0x48] sm:$0xff]  }
 0x23c   :  { %2985 = vmatprep.subr.bf16.mxu0 %v3180_v38  ;;  %v3201_v38 = vld [vmem:[%s3961_s2 + $0x370] sm:$0xff]  }
 0x23f   :  { %2986 = vmatpush3.bf16.msra.mxu0 %v3181_v39  ;;  %v3202_v39 = vld [vmem:[%s3961_s2 + $0x330] sm:$0xff]  }
 0x240   :  { %2987 = vmatprep.subr.bf16.mxu0 %v3182_v40  ;;  %v3203_v40 = vld [vmem:[%s3961_s2 + $0x378] sm:$0xff]  }
 0x243   :  { %2988 = vmatpush3.bf16.msra.mxu0 %v3183_v41  ;;  %v3204_v41 = vld [vmem:[%s3961_s2 + $0x338] sm:$0xff]  }
 0x244   :  { %1784 = vmatprep.subr.bf16.mxu0 %v3532_v10 }
 0x2dd   :  { %v1441_v47 = vpop.f32.mrb[20].mxu1 }
 0x2de   :  { %v1443_v48 = vpop.f32.mrb[21].mxu1 }
 0x2df   :  { %v1445_v49 = vpop.f32.mrb[22].mxu1 }
 0x2e0   :  { %v1462_v50 = vmax.f32 %v1441_v47, %v1445_v49  ;;  %v1447_v52 = vpop.f32.mrb[23].mxu1  ;;  %v3210_v47 = vld [vmem:[%s3961_s2 + $0x350] sm:$0xff]   ;;  %v3212_v49 = vld [vmem:[%s3961_s2 + $0x358] sm:$0xff]  }
 0x2e1   :  { %v1463_v53 = vmax.f32 %v1443_v48, %v1447_v52  ;;  %v3211_v48 = vld [vmem:[%s3961_s2 + $0x398] sm:$0xff]   ;;  %v3217_v52 = vld [vmem:[%s3961_s2 + $0x430] sm:$0xff]  }
 0x2e5   :  { %v1451_v56 = vpop.f32.mrb[24].mxu1 }
 0x2e6   :  { %v1453_v58 = vpop.f32.mrb[25].mxu1 }
 0x2e7   :  { %v1455_v60 = vpop.f32.mrb[26].mxu1 }
 0x2e8   :  { %v1466_v61 = vmax.f32 %v1451_v56, %v1455_v60  ;;  %v1457_v62 = vpop.f32.mrb[27].mxu1  ;;  %v3221_v56 = vld [vmem:[%s3961_s2 + $0x3f8] sm:$0xff]   ;;  %v3224_v60 = vld [vmem:[%s3961_s2 + $0x400] sm:$0xff]  }
 0x2e9   :  { %v1467_v0 = vmax.f32 %v1453_v58, %v1457_v62  ;;  %v3223_v58 = vld [vmem:[%s3961_s2 + $0x440] sm:$0xff]   ;;  %v3227_v62 = vld [vmem:[%s3961_s2 + $0x408] sm:$0xff]  }
 0x2ea   :  { %v1470_v2 = vmax.f32 %v1462_v50, %v1466_v61  ;;  %v3214_v50 = vld [vmem:[%s3961_s2 + $0x428] sm:$0xff]  }
 0x2eb   :  { %v1471_v3 = vmax.f32 %v1463_v53, %v1467_v0  ;;  %v3218_v53 = vld [vmem:[%s3961_s2 + $0x3f0] sm:$0xff]   ;;  %v3226_v61 = vld [vmem:[%s3961_s2 + $0x448] sm:$0xff]  }
 0x2ec   :  { %v1474_v5 = vmax.f32 %v1470_v2, 0.0  ;;  %v3230_v0 = vld [vmem:[%s3961_s2 + $0x410] sm:$0xff]   ;;  %v3232_v2 = vld [vmem:[%s3961_s2 + $0x458] sm:$0xff]  }
 0x2ed   :  { %v1475_v7 = vmax.f32 %v1471_v3, 0.0  ;;  %v3233_v3 = vld [vmem:[%s3961_s2 + $0x418] sm:$0xff]  }
 0x2ee   :  { %v1478_v9 = vpack.c.bf16 %v1474_v5, %v1474_v5  ;;  %v3235_v5 = vld [vmem:[%s3961_s2 + $0x460] sm:$0xff]  }
 0x2ef   :  { %v1479_v59 = vpack.c.bf16 %v1475_v7, %v1475_v7 }
 0x2f1   :  { %v2967_v13 = vpop.f32.mrb[40].mxu0  ;;  %2838 = vmatprep.mubr.msk.bf16.mxu1 %vm59_vm0, %v1479_v59 }
 0x2f2   :  { %v2968_v14 = vpop.f32.mrb[41].mxu0  ;;  %1756 = vmatmul.mubr.bf16.vlgmr.msra.gmra.mrb[8].mxu1 %v1478_v9 }
 0x2f3   :  { %v2969_v15 = vadd.f32 %v2968_v14, %v2967_v13  ;;  %v2970_v16 = vpop.f32.mrb[42].mxu0  ;;  %2996 = vmatpush3.bf16.msra.mxu1 %v3198_v12 }
 0x2f4   :  { %v2971_v17 = vpop.f32.mrb[43].mxu0 }
 0x2f5   :  { %v3742_v18 = vadd.f32 %v3634_v4, %v2969_v15  ;;  %v3184_v4 = vld [vmem:[%s3960_s0 + $0x40] sm:$0xff]  }
 0x2f9   :  { %v1388_v19 = vpop.f32.mrb[44].mxu0 }
 0x2fa   :  { %v1390_v20 = vpop.f32.mrb[45].mxu0 }
 0x2fb   :  { %v1392_v21 = vpop.f32.mrb[46].mxu0 }
 0x2fc   :  { %v1460_v22 = vmax.f32 %v1388_v19, %v1392_v21  ;;  %v1394_v23 = vpop.f32.mrb[47].mxu0 }
 0x2fd   :  { %v1461_v24 = vmax.f32 %v1390_v20, %v1394_v23 }
 0x301   :  { %v1398_v25 = vpop.f32.mrb[48].mxu0 }
 0x302   :  { %v1400_v26 = vpop.f32.mrb[49].mxu0 }
 0x303   :  { %v1402_v27 = vpop.f32.mrb[50].mxu0 }
 0x304   :  { %v1464_v28 = vmax.f32 %v1398_v25, %v1402_v27  ;;  %v1404_v29 = vpop.f32.mrb[51].mxu0 }
 0x305   :  { %v1465_v30 = vmax.f32 %v1400_v26, %v1404_v29 }
 0x306   :  { %v1468_v31 = vmax.f32 %v1460_v22, %v1464_v28 }
 0x307   :  { %v1469_v32 = vmax.f32 %v1461_v24, %v1465_v30 }
 0x308   :  { %v1472_v33 = vmax.f32 %v1468_v31, 0.0 }
 0x309   :  { %v1473_v34 = vmax.f32 %v1469_v32, 0.0 }
 0x30a   :  { %v1476_v36 = vpack.c.bf16 %v1472_v33, %v1472_v33  ;;  %v3213_v33 = vld [vmem:[%s3961_s2 + $0x3a0] sm:$0xff]  }
 0x30b   :  { %v1477_v35 = vpack.c.bf16 %v1473_v34, %v1473_v34 }
 0x30d   :  { %1715 = vmatprep.mubr.bf16.mxu0 %v1477_v35 }
 0x30e   :  { %1716 = vmatmul.mubr.bf16.vlgmr.msra.gmra.mrb[52].mxu0 %v1476_v36 }
 0x30f   :  { %1785 = vmatpush1.bf16.msra.mxu0 %v3538_v11  ;;  %1816 = vmatprep.mubr.bf16.mxu0 %v3257_v1 }
 0x310   :  { %1837 = vmatprep.subr.bf16.mxu0 %v3475_v55 }
 0x316   :  { %2841 = vmatmul.mubr.msk.bf16.vlgmr.msra.gmra.mrb[56].mxu0 %vm59_vm0, %v3184_v4 }
 0x317   :  { %1826 = vmatprep.mubr.bf16.mxu0 %v3257_v1  ;;  %1838 = vmatpush1.bf16.msra.mxu0 %v3484_v57 }
 0x318   :  { %2214 = vmatprep.subr.bf16.mxu0 %v3532_v10  ;;  %v3186_v10 = vld [vmem:[%s3960_s0 + $0x50] sm:$0xff]  }
 0x31e   :  { %2842 = vmatmul.mubr.msk.bf16.gmra.mrb[60].mxu0 %vm59_vm0, %v3185_v37 }
 0x31f   :  { %1869 = vmatprep.mubr.bf16.mxu0 %v3257_v1 }
 0x326   :  { %2843 = vmatmul.mubr.msk.bf16.vlgmr.msra.gmra.mrb[64].mxu0 %vm59_vm0, %v3184_v4 }
 0x327   :  { %1879 = vmatprep.mubr.bf16.mxu0 %v3257_v1  ;;  %2215 = vmatpush1.bf16.msra.mxu0 %v3538_v11  ;;  %v3187_v11 = vld [vmem:[%s3960_s0 + $0x58] sm:$0xff]  }
 0x328   :  { %2267 = vmatprep.subr.bf16.mxu0 %v3475_v55  ;;  %v3199_v55 = vld [vmem:[%s3961_s2 + $0x368] sm:$0xff]  }
 0x329   :  { %2997 = vmatprep.subr.bf16.mxu1 %v3199_v55 }
 0x32e   :  { %2844 = vmatmul.mubr.msk.bf16.gmra.mrb[68].mxu0 %vm59_vm0, %v3185_v37 }
 0x32f   :  { %2246 = vmatprep.mubr.bf16.mxu0 %v3257_v1 }
 0x336   :  { %2873 = vmatmul.mubr.msk.bf16.vlgmr.msra.gmra.mrb[72].mxu0 %vm59_vm0, %v3186_v10 }
 0x337   :  { %2256 = vmatprep.mubr.bf16.mxu0 %v3257_v1  ;;  %2268 = vmatpush1.bf16.msra.mxu0 %v3484_v57  ;;  %v3200_v57 = vld [vmem:[%s3961_s2 + $0x328] sm:$0xff]  }
 0x338   :  { %2998 = vmatpush3.bf16.msra.mxu1 %v3200_v57  ;;  %3017 = vmatprep.subr.bf16.mxu0 %v3214_v50  ;;  %v3219_v57 = vld [vmem:[%s3961_s2 + $0x3b0] sm:$0xff]  }
 0x339   :  { %2999 = vmatprep.subr.bf16.mxu1 %v3201_v38 }
 0x33c   :  { %3000 = vmatpush3.bf16.msra.mxu1 %v3202_v39 }
 0x33d   :  { %3001 = vmatprep.subr.bf16.mxu1 %v3203_v40 }
 0x33e   :  { %2874 = vmatmul.mubr.msk.bf16.gmra.mrb[76].mxu0 %vm59_vm0, %v3187_v11 }
 0x33f   :  { %2299 = vmatprep.mubr.bf16.mxu0 %v3257_v1 }
 0x340   :  { %3002 = vmatpush3.bf16.msra.mxu1 %v3204_v41 }
 0x341   :  { %3003 = vmatprep.subr.bf16.mxu1 %v3205_v42 }
 0x344   :  { %3004 = vmatpush3.bf16.msra.mxu1 %v3206_v43  ;;  %v3222_v43 = vld [vmem:[%s3961_s2 + $0x3b8] sm:$0xff]  }
 0x345   :  { %3005 = vmatprep.subr.bf16.mxu1 %v3207_v44 }
 0x346   :  { %2875 = vmatmul.mubr.msk.bf16.vlgmr.msra.gmra.mrb[80].mxu0 %vm59_vm0, %v3186_v10  ;;  %v3216_v10 = vld [vmem:[%s3961_s2 + $0x3a8] sm:$0xff]  }
 0x347   :  { %2309 = vmatprep.mubr.bf16.mxu0 %v3257_v1  ;;  %3018 = vmatpush3.bf16.msra.mxu0 %v3215_v51 }
 0x348   :  { %3006 = vmatpush3.bf16.msra.mxu1 %v3208_v45  ;;  %3019 = vmatprep.subr.bf16.mxu0 %v3217_v52 }
 0x349   :  { %3007 = vmatprep.subr.bf16.mxu1 %v3209_v46 }
 0x34b   :  { %3020 = vmatpush3.bf16.msra.mxu0 %v3218_v53 }
 0x34c   :  { %3008 = vmatpush3.bf16.msra.mxu1 %v3210_v47  ;;  %3021 = vmatprep.subr.bf16.mxu0 %v3220_v54  ;;  %v3228_v54 = vld [vmem:[%s3961_s2 + $0x3c8] sm:$0xff]  }
 0x34d   :  { %3009 = vmatprep.subr.bf16.mxu1 %v3211_v48 }
 0x34e   :  { %2876 = vmatmul.mubr.msk.bf16.gmra.mrb[84].mxu0 %vm59_vm0, %v3187_v11 }
 0x34f   :  { %3022 = vmatpush3.bf16.msra.mxu0 %v3221_v56 }
 0x350   :  { %3010 = vmatpush3.bf16.msra.mxu1 %v3212_v49  ;;  %3023 = vmatprep.subr.bf16.mxu0 %v3223_v58  ;;  %v3225_v49 = vld [vmem:[%s3961_s2 + $0x3c0] sm:$0xff]  }
 0x351   :  { %2153 = vmatprep.subr.bf16.mxu1 %v3257_v1 }
 0x353   :  { %3024 = vmatpush3.bf16.msra.mxu0 %v3224_v60 }
 0x354   :  { %3025 = vmatprep.subr.bf16.mxu0 %v3226_v61  ;;  %v3231_v61 = vld [vmem:[%s3961_s2 + $0x3d0] sm:$0xff]  }
 0x357   :  { %3026 = vmatpush3.bf16.msra.mxu0 %v3227_v62 }
 0x358   :  { %3027 = vmatprep.subr.bf16.mxu0 %v3229_v63 }
 0x35b   :  { %3028 = vmatpush3.bf16.msra.mxu0 %v3230_v0 }
 0x35c   :  { %3029 = vmatprep.subr.bf16.mxu0 %v3232_v2 }
 0x35f   :  { %3030 = vmatpush3.bf16.msra.mxu0 %v3233_v3 }
 0x360   :  { %3031 = vmatprep.subr.bf16.mxu0 %v3235_v5  ;;  %v3234_v5 = vld [vmem:[%s3961_s2 + $0x3d8] sm:$0xff]  }
 0x363   :  { %3032 = vmatpush3.bf16.msra.mxu0 %v3236_v6 }
 0x3e1   :  { %v2989_v7 = vpop.f32.mrb[52].mxu0 }
 0x3e2   :  { %v2990_v8 = vpop.f32.mrb[53].mxu0 }
 0x3e3   :  { %v2991_v9 = vadd.f32 %v2990_v8, %v2989_v7  ;;  %v2992_v59 = vpop.f32.mrb[54].mxu0 }
 0x3e4   :  { %v2993_v12 = vpop.f32.mrb[55].mxu0 }
 0x3e5   :  { %v3871_v13 = vadd.f32 %v3742_v18, %v2991_v9 }
 0x3e9   :  { %v1818_v14 = vpop.f32.mrb[56].mxu0 }
 0x3ea   :  { %v1820_v15 = vpop.f32.mrb[57].mxu0 }
 0x3eb   :  { %v1822_v16 = vpop.f32.mrb[58].mxu0 }
 0x3ec   :  { %v1890_v17 = vmax.f32 %v1818_v14, %v1822_v16  ;;  %v1824_v19 = vpop.f32.mrb[59].mxu0  ;;  %v3237_v14 = vld [vmem:[%s3961_s2 + $0x3e0] sm:$0xff]  }
 0x3ed   :  { %v1891_v20 = vmax.f32 %v1820_v15, %v1824_v19 }
 0x3f1   :  { %v1828_v21 = vpop.f32.mrb[60].mxu0 }
 0x3f2   :  { %v1830_v22 = vpop.f32.mrb[61].mxu0 }
 0x3f3   :  { %v1832_v23 = vpop.f32.mrb[62].mxu0 }
 0x3f4   :  { %v1894_v24 = vmax.f32 %v1828_v21, %v1832_v23  ;;  %v1834_v25 = vpop.f32.mrb[63].mxu0  ;;  %v3238_v21 = vld [vmem:[%s3961_s2 + $0x468] sm:$0xff]  }
 0x3f5   :  { %v1895_v26 = vmax.f32 %v1830_v22, %v1834_v25  ;;  %v3239_v25 = vld [vmem:[%s3961_s2 + $0x470] sm:$0xff]  }
 0x3f6   :  { %v1898_v27 = vmax.f32 %v1890_v17, %v1894_v24 }
 0x3f7   :  { %v1899_v28 = vmax.f32 %v1891_v20, %v1895_v26 }
 0x3f8   :  { %v1902_v29 = vmax.f32 %v1898_v27, 0.0 }
 0x3f9   :  { %v1903_v30 = vmax.f32 %v1899_v28, 0.0  ;;  %v1871_v31 = vpop.f32.mrb[64].mxu0 }
 0x3fa   :  { %v1873_v32 = vpop.f32.mrb[65].mxu0  ;;  %v1906_v35 = vpack.c.bf16 %v1902_v29, %v1902_v29 }
 0x3fb   :  { %v1907_v18 = vpack.c.bf16 %v1903_v30, %v1903_v30  ;;  %v1875_v34 = vpop.f32.mrb[66].mxu0 }
 0x3fc   :  { %v1892_v36 = vmax.f32 %v1871_v31, %v1875_v34  ;;  %v1877_v4 = vpop.f32.mrb[67].mxu0  ;;  %v3240_v31 = vld [vmem:[%s3961_s2 + $0x478] sm:$0xff]  }
 0x3fd   :  { %2145 = vmatprep.mubr.bf16.mxu1 %v1907_v18  ;;  %v1893_v37 = vmax.f32 %v1873_v32, %v1877_v4  ;;  %v3244_v4 = vld [vmem:[%s3961_s2 + $0x498] sm:$0xff]  }
 0x3fe   :  { %2146 = vmatmul.mubr.bf16.vlgmr.msra.gmra.mrb[28].mxu1 %v1906_v35  ;;  %v3242_v35 = vld [vmem:[%s3961_s2 + $0x488] sm:$0xff]  }
 0x3ff   :  { %2154 = vmatpush1.bf16.msra.mxu1 %v3213_v33  ;;  %v3241_v33 = vld [vmem:[%s3961_s2 + $0x480] sm:$0xff]  }
 0x400   :  { %2155 = vmatprep.subr.bf16.mxu1 %v3257_v1 }
 0x401   :  { %v1881_v11 = vpop.f32.mrb[68].mxu0 }
 0x402   :  { %v1883_v55 = vpop.f32.mrb[69].mxu0 }
 0x403   :  { %2156 = vmatpush1.bf16.msra.mxu1 %v3216_v10  ;;  %v1885_v38 = vpop.f32.mrb[70].mxu0  ;;  %v3246_v10 = vld [vmem:[%s3961_s2 + $0x4a8] sm:$0xff]  }
 0x404   :  { %2157 = vmatprep.subr.bf16.mxu1 %v3257_v1  ;;  %v1896_v39 = vmax.f32 %v1881_v11, %v1885_v38  ;;  %v1887_v40 = vpop.f32.mrb[71].mxu0  ;;  %v3247_v38 = vld [vmem:[%s3962_s3] sm:$0xff]  }
 0x405   :  { %v1897_v41 = vmax.f32 %v1883_v55, %v1887_v40 }
 0x406   :  { %v1900_v42 = vmax.f32 %v1892_v36, %v1896_v39  ;;  %v3243_v36 = vld [vmem:[%s3961_s2 + $0x490] sm:$0xff]   ;;  %v3248_v39 = vld [vmem:[%s3962_s3 + $0x8] ss:$0 sps:$4 sm:$0x33]  }
 0x407   :  { %2158 = vmatpush1.bf16.msra.mxu1 %v3219_v57  ;;  %v1901_v44 = vmax.f32 %v1893_v37, %v1897_v41  ;;  %v3245_v37 = vld [vmem:[%s3961_s2 + $0x4a0] sm:$0xff]   ;;  %v3258_v57 = vmov 0.0   ;;  %v2650_v40 = vsel %vm2648_vm1, %v3248_v39, 0 }
 0x408   :  { %2159 = vmatprep.subr.bf16.mxu1 %v3257_v1  ;;  %v1904_v16 = vmax.f32 %v1900_v42, 0.0  ;;  %3042 = vmatprep.subr.bf16.mxu0 %v3258_v57 }
 0x409   :  { %v1905_v45 = vmax.f32 %v1901_v44, 0.0  ;;  %v2248_v46 = vpop.f32.mrb[72].mxu0 }
 0x40a   :  { %v2250_v47 = vpop.f32.mrb[73].mxu0  ;;  %v1908_v22 = vpack.c.bf16 %v1904_v16, %v1904_v16 }
 0x40b   :  { %2160 = vmatpush1.bf16.msra.mxu1 %v3222_v43  ;;  %v1909_v48 = vpack.c.bf16 %v1905_v45, %v1905_v45  ;;  %v2252_v50 = vpop.f32.mrb[74].mxu0 }
 0x40c   :  { %2161 = vmatprep.subr.bf16.mxu1 %v3257_v1  ;;  %v2320_v51 = vmax.f32 %v2248_v46, %v2252_v50  ;;  %v2254_v52 = vpop.f32.mrb[75].mxu0 }
 0x40d   :  { %v2321_v53 = vmax.f32 %v2250_v47, %v2254_v52  ;;  %2870 = vmatprep.mubr.msk.bf16.mxu1 %vm59_vm0, %v1909_v48 }
 0x40f   :  { %2162 = vmatpush1.bf16.msra.mxu1 %v3225_v49 }
 0x410   :  { %2163 = vmatprep.subr.bf16.mxu1 %v3257_v1 }
 0x411   :  { %v2258_v56 = vpop.f32.mrb[76].mxu0 }
 0x412   :  { %v2260_v58 = vpop.f32.mrb[77].mxu0 }
 0x413   :  { %2164 = vmatpush1.bf16.msra.mxu1 %v3228_v54  ;;  %v2262_v60 = vpop.f32.mrb[78].mxu0 }
 0x414   :  { %v2324_v62 = vmax.f32 %v2258_v56, %v2262_v60  ;;  %v2264_v63 = vpop.f32.mrb[79].mxu0  ;;  %2165 = vmatprep.subr.bf16.mxu1 %v3257_v1 }
 0x415   :  { %v2325_v0 = vmax.f32 %v2260_v58, %v2264_v63 }
 0x416   :  { %v2328_v2 = vmax.f32 %v2320_v51, %v2324_v62 }
 0x417   :  { %v2329_v3 = vmax.f32 %v2321_v53, %v2325_v0  ;;  %2166 = vmatpush1.bf16.msra.mxu1 %v3231_v61  ;;  %v2903_v61 = vld [vmem:[%s3963_s4] ss:$0 sm:$0xff] }
 0x418   :  { %v2332_v6 = vmax.f32 %v2328_v2, 0.0  ;;  %2167 = vmatprep.subr.bf16.mxu1 %v3257_v1 }
 0x419   :  { %v2333_v7 = vmax.f32 %v2329_v3, 0.0  ;;  %v2301_v8 = vpop.f32.mrb[80].mxu0 }
 0x41a   :  { %v2336_v9 = vpack.c.bf16 %v2332_v6, %v2332_v6  ;;  %v2303_v59 = vpop.f32.mrb[81].mxu0 }
 0x41b   :  { %v2337_v12 = vpack.c.bf16 %v2333_v7, %v2333_v7  ;;  %2168 = vmatpush1.bf16.msra.mxu1 %v3234_v5  ;;  %v2305_v15 = vpop.f32.mrb[82].mxu0 }
 0x41c   :  { %2169 = vmatprep.subr.bf16.mxu1 %v3257_v1  ;;  %v2322_v17 = vmax.f32 %v2301_v8, %v2305_v15  ;;  %v2307_v19 = vpop.f32.mrb[83].mxu0 }
 0x41d   :  { %2575 = vmatprep.mubr.bf16.mxu0 %v2337_v12  ;;  %v2323_v20 = vmax.f32 %v2303_v59, %v2307_v19 }
 0x41e   :  { %2576 = vmatmul.mubr.bf16.vlgmr.msra.gmra.mrb[88].mxu0 %v2336_v9 }
 0x41f   :  { %2170 = vmatpush1.bf16.msra.mxu1 %v3237_v14  ;;  %3043 = vmatpush3.bf16.msra.mxu0 %v3247_v38 }
 0x420   :  { %2583 = vmatprep.subr.bf16.mxu1 %v3257_v1  ;;  %3044 = vmatprep.subr.bf16.mxu0 %v3258_v57 }
 0x421   :  { %v2311_v23 = vpop.f32.mrb[84].mxu0  ;;  %3046 = vmatprep.mubr.msk.bf16.mxu0 %vm3259_vm2, %v3258_v57 }
 0x422   :  { %2186 = vmatmul.mubr.bf16.vlgmr.msra.gmra.mrb[8].mxu1 %v1908_v22  ;;  %v2313_v24 = vpop.f32.mrb[85].mxu0 }
 0x423   :  { %2584 = vmatpush1.bf16.msra.mxu1 %v3238_v21  ;;  %v2315_v26 = vpop.f32.mrb[86].mxu0  ;;  %3045 = vmatpush3.bf16.msra.mxu0 %v2650_v40 }
 0x424   :  { %2585 = vmatprep.subr.bf16.mxu1 %v3257_v1  ;;  %v2326_v27 = vmax.f32 %v2311_v23, %v2315_v26  ;;  %v2317_v28 = vpop.f32.mrb[87].mxu0 }
 0x425   :  { %v2327_v29 = vmax.f32 %v2313_v24, %v2317_v28 }
 0x426   :  { %v2330_v30 = vmax.f32 %v2322_v17, %v2326_v27 }
 0x427   :  { %2586 = vmatpush1.bf16.msra.mxu1 %v3239_v25  ;;  %v2331_v32 = vmax.f32 %v2323_v20, %v2327_v29 }
 0x428   :  { %2587 = vmatprep.subr.bf16.mxu1 %v3257_v1  ;;  %v2334_v11 = vmax.f32 %v2330_v30, 0.0 }
 0x429   :  { %v2335_v18 = vmax.f32 %v2331_v32, 0.0 }
 0x42a   :  { %v2338_v55 = vpack.c.bf16 %v2334_v11, %v2334_v11 }
 0x42b   :  { %2588 = vmatpush1.bf16.msra.mxu1 %v3240_v31  ;;  %v2339_v34 = vpack.c.bf16 %v2335_v18, %v2335_v18 }
 0x42c   :  { %2589 = vmatprep.subr.bf16.mxu1 %v3257_v1 }
 0x42d   :  { %2902 = vmatprep.mubr.msk.bf16.mxu1 %vm59_vm0, %v2339_v34 }
 0x42f   :  { %2590 = vmatpush1.bf16.msra.mxu1 %v3241_v33 }
 0x430   :  { %2591 = vmatprep.subr.bf16.mxu1 %v3257_v1 }
 0x433   :  { %2592 = vmatpush1.bf16.msra.mxu1 %v3242_v35 }
 0x434   :  { %2593 = vmatprep.subr.bf16.mxu1 %v3257_v1 }
 0x437   :  { %2594 = vmatpush1.bf16.msra.mxu1 %v3243_v36 }
 0x438   :  { %2595 = vmatprep.subr.bf16.mxu1 %v3257_v1 }
 0x43b   :  { %2596 = vmatpush1.bf16.msra.mxu1 %v3244_v4 }
 0x43c   :  { %2597 = vmatprep.subr.bf16.mxu1 %v3257_v1 }
 0x43f   :  { %2598 = vmatpush1.bf16.msra.mxu1 %v3245_v37 }
 0x440   :  { %2599 = vmatprep.subr.bf16.mxu1 %v3257_v1 }
 0x443   :  { %2600 = vmatpush1.bf16.msra.mxu1 %v3246_v10 }
 0x446   :  { %2616 = vmatmul.mubr.bf16.vlgmr.msra.gmra.mrb[8].mxu1 %v2338_v55 }
 0x4d1   :  { %v3011_v1 = vpop.f32.mrb[28].mxu1 }
 0x4d2   :  { %v3012_v41 = vpop.f32.mrb[29].mxu1 }
 0x4d3   :  { %v3013_v42 = vadd.f32 %v3012_v41, %v3011_v1  ;;  %v3014_v43 = vpop.f32.mrb[30].mxu1 }
 0x4d4   :  { %v3015_v44 = vpop.f32.mrb[31].mxu1 }
 0x4d5   :  { %v3053_v45 = vadd.f32 %v3871_v13, %v3013_v42 }
 0x4f1   :  { %v3033_v46 = vpop.f32.mrb[88].mxu0 }
 0x4f2   :  { %v3034_v47 = vpop.f32.mrb[89].mxu0 }
 0x4f3   :  { %v3035_v48 = vadd.f32 %v3034_v47, %v3033_v46  ;;  %v3036_v49 = vpop.f32.mrb[90].mxu0 }
 0x4f4   :  { %v3037_v50 = vpop.f32.mrb[91].mxu0 }
 0x4f5   :  { %v3054_v51 = vadd.f32 %v3053_v45, %v3035_v48 }
 0x519   :  { %v2617_v52 = vpop.f32.mrb[8].mxu1 }
 0x51a   :  { %v3055_v53 = vadd.f32 %v3054_v51, %v2617_v52  ;;  %v2619_v54 = vpop.f32.mrb[9].mxu1 }
 0x51b   :  { %v2620_v56 = vpop.f32.mrb[10].mxu1 }
 0x51c   :  { %v2624_v58 = vpack.c.bf16 %v3055_v53, %v3055_v53  ;;  %v2621_v60 = vpop.f32.mrb[11].mxu1 }
 0x51e   :  { %3047 = vmatmul.mubr.msk.bf16.vlgmr.msra.gmra.mrb[92].mxu0 %vm2644_vm3, %v2624_v58 }
 0x5f1   :  { %v2686_v62 = vpop.f32.mrb[92].mxu0 }
 0x5f2   :  { %v2687_v13 = vadd.f32 %v2903_v61, %v2686_v62  ;;  %v3048_v63 = vpop.f32.mrb[93].mxu0 }
 0x5f3   :  { %v2689_v0 = vpop.f32.mrb[94].mxu0 }
 0x5f4   :  { %2692 = vmax.xlane.f32.xlu0 %v2687_v13  ;;  %v3049_v2 = vpop.f32.mrb[95].mxu0 }
 0x681   :  { %v2693_v3 = vpop.xlane.xlu0 %2692 }
 0x682   :  { %v2694_v5 = vsub.f32 %v2687_v13, %v2693_v3 }
 0x684   :  { %v2695_v6 = vmul.f32 1.442695, %v2694_v5 }
 0x686   :  { %3249 = vpow2.f32 %v2695_v6 }
 0x690   :  { %v3250_v7 = vpop.eup %3249 }
 0x691   :  { %2697 = vadd.xlane.f32.xlu0 %v3250_v7 }
 0x71e   :  { %v2698_v8 = vpop.xlane.xlu0 %2697 }
 0x71f   :  { %3251 = vlog2.f32 %v2698_v8 }
 0x729   :  { %v3252_v9 = vpop.eup %3251 }
 0x72a   :  { %v2700_v59 = vmul.f32 0.6931472, %v3252_v9 }
 0x72c   :  { %v2701_v12 = vsub.f32 %v2694_v5, %v2700_v59 }
 0x72e   :  { %2702 = vst [vmem:[%s3964_s5] sm:$0xff] %v2701_v12 }

</bundles_post_ra>
